<compile_context>
chip_gen: v5e
topology: v5e:2x2
jax: 0.10.0
libtpu: 0.0.40
codegen_flags: <defaults>
</compile_context>

<pallas_src>
import jax
import jax.numpy as jnp
from jax.experimental import pallas as pl
from jax.experimental.pallas import tpu as pltpu


# --------------------------- fused GRU + FC kernel ---------------------------
def gru_fc_kernel(x_ref,        # (T*Bp, I)        time-major, batch padded to Bp
                  wih_ref,      # (I, 3*Hp)        gate g in lanes [g*Hp : g*Hp+H]
                  whh_ref,      # (Hp, 3*Hp)       rows >= H are zero
                  bi_ref,       # (1, 3*Hp)        folded input-side biases
                  bhn_ref,      # (1, Hp)          hidden-side new-gate bias
                  wfc_ref,      # (Hp, O_pad)
                  bfc_ref,      # (1, O_pad)
                  h0_ref,       # (Bp, Hp)
                  out_ref,      # (T*Bp, O_pad)
                  gi_scr):      # (T*Bp, 3*Hp) f32 scratch
    Bp, Hp = h0_ref.shape
    T = x_ref.shape[0] // Bp

    # ---- input projection for ALL timesteps: one fused matmul, one buffer.
    #      (r/z biases pre-folded as b_ir+b_hr, b_iz+b_hz; b_in folded too.
    #       b_hn must stay inside the loop because it is multiplied by r.)
    gi_scr[...] = (jnp.dot(x_ref[...], wih_ref[...],
                           preferred_element_type=jnp.float32) + bi_ref[...])

    whh = whh_ref[...]
    bhn = bhn_ref[...]

    # ---- serial recurrence, fully unrolled (T is small & static).
    #      One (Bp, Hp) x (Hp, 3*Hp) MXU op per step; gate slices are full
    #      128-lane blocks; state h stays in vregs (no scratch stores).
    h = h0_ref[...]
    hs = []
    for t in range(T):
        r0 = t * Bp
        gi_t = gi_scr[r0:r0 + Bp, :]                       # full (8, 3*Hp) tile
        gh = jnp.dot(h, whh, preferred_element_type=jnp.float32)
        r = jax.nn.sigmoid(gi_t[:, 0:Hp] + gh[:, 0:Hp])
        z = jax.nn.sigmoid(gi_t[:, Hp:2 * Hp] + gh[:, Hp:2 * Hp])
        n = jnp.tanh(gi_t[:, 2 * Hp:] + r * (gh[:, 2 * Hp:] + bhn))
        h = (1.0 - z) * n + z * h
        hs.append(h)

    # ---- fused FC epilogue on the register-resident hidden sequence.
    #      Dropout(p) in eval mode == identity.  Output is lane-dense (O_pad).
    h_seq = jnp.concatenate(hs, axis=0)                    # (T*Bp, Hp)
    out_ref[...] = (jnp.dot(h_seq, wfc_ref[...],
                            preferred_element_type=jnp.float32)
                    + bfc_ref[...]).astype(out_ref.dtype)


# ----------------------- one-time parameter packing ---------------------------
def prepare_params(raw, input_size, hidden_size, out_size, batch_size):
    """Repack PyTorch-layout GRU/FC params into lane-padded, pre-transposed
    matrices.  Called ONCE, off the forward call path."""
    H, I, O = hidden_size, input_size, out_size
    Hp = 128 * pl.cdiv(H, 128)            # each gate gets its own 128-lane block
    O_pad = 128 * pl.cdiv(O, 128)         # lane-dense output stores
    Bp = 8 * pl.cdiv(batch_size, 8)       # full sublane tile for the batch

    w_ih, w_hh, b_ih, b_hh = raw["w_ih"], raw["w_hh"], raw["b_ih"], raw["b_hh"]

    wih_cat = jnp.zeros((I, 3 * Hp), jnp.float32)
    whh_cat = jnp.zeros((Hp, 3 * Hp), jnp.float32)
    for g in range(3):                    # gate order: r, z, n (PyTorch layout)
        wih_cat = wih_cat.at[:, g * Hp:g * Hp + H].set(w_ih[g * H:(g + 1) * H].T)
        whh_cat = whh_cat.at[:H, g * Hp:g * Hp + H].set(w_hh[g * H:(g + 1) * H].T)

    bi_cat = jnp.zeros((1, 3 * Hp), jnp.float32)
    bi_cat = bi_cat.at[0, 0:H].set(b_ih[0:H] + b_hh[0:H])                # r
    bi_cat = bi_cat.at[0, Hp:Hp + H].set(b_ih[H:2 * H] + b_hh[H:2 * H])  # z
    bi_cat = bi_cat.at[0, 2 * Hp:2 * Hp + H].set(b_ih[2 * H:3 * H])      # n (input side)
    bhn_p = jnp.zeros((1, Hp), jnp.float32).at[0, :H].set(b_hh[2 * H:3 * H])

    wfc_p = jnp.zeros((Hp, O_pad), jnp.float32).at[:H, :O].set(raw["w_fc"].T)
    bfc_p = jnp.zeros((1, O_pad), jnp.float32).at[0, :O].set(raw["b_fc"])

    h0 = jnp.zeros((Bp, Hp), jnp.float32)
    return dict(wih_cat=wih_cat, whh_cat=whh_cat, bi_cat=bi_cat, bhn_p=bhn_p,
                wfc_p=wfc_p, bfc_p=bfc_p, h0=h0)


# --------------------------------- wrapper ------------------------------------
def model_forward(x, packed, out_size):
    """x: (B, T, I) batch-first (like the PyTorch module). Returns (B, T, O)."""
    B, T, I = x.shape
    Bp, Hp = packed["h0"].shape
    O_pad = packed["wfc_p"].shape[1]

    # Pad batch to a full sublane tile and go time-major: row t*Bp+b = (b, t).
    x_pad = jnp.zeros((Bp, T, I), x.dtype).at[:B].set(x)
    x_tm = jnp.transpose(x_pad, (1, 0, 2)).reshape(T * Bp, I)

    out_flat = pl.pallas_call(
        gru_fc_kernel,
        out_shape=jax.ShapeDtypeStruct((T * Bp, O_pad), jnp.float32),
        scratch_shapes=[pltpu.VMEM((T * Bp, 3 * Hp), jnp.float32)],   # gi
    )(x_tm,
      packed["wih_cat"], packed["whh_cat"], packed["bi_cat"], packed["bhn_p"],
      packed["wfc_p"], packed["bfc_p"], packed["h0"])

    out = out_flat.reshape(T, Bp, O_pad)
    return jnp.transpose(out, (1, 0, 2))[:B, :, :out_size]            # (B, T, O)


# ------------------------------ pure-JAX reference ----------------------------
def model_reference(x, raw):
    B, T, I = x.shape
    H = raw["w_hh"].shape[1]
    w_ih, w_hh, b_ih, b_hh = raw["w_ih"], raw["w_hh"], raw["b_ih"], raw["b_hh"]
    h = jnp.zeros((B, H), jnp.float32)
    hs = []
    for t in range(T):
        xt = x[:, t, :]
        gi = xt @ w_ih.T + b_ih
        gh = h @ w_hh.T + b_hh
        i_r, i_z, i_n = gi[:, :H], gi[:, H:2 * H], gi[:, 2 * H:]
        h_r, h_z, h_n = gh[:, :H], gh[:, H:2 * H], gh[:, 2 * H:]
        r = jax.nn.sigmoid(i_r + h_r)
        z = jax.nn.sigmoid(i_z + h_z)
        n = jnp.tanh(i_n + r * h_n)
        h = (1.0 - z) * n + z * h
        hs.append(h)
    h_seq = jnp.stack(hs, axis=1)                           # (B, T, H)
    return h_seq @ raw["w_fc"].T + raw["b_fc"]


# ------------------------------------ main -------------------------------------
def init_raw_params(key, input_size, hidden_size, out_size):
    H = hidden_size
    k = jax.random.split(key, 6)
    s = 1.0 / jnp.sqrt(H)
    return dict(
        w_ih=jax.random.uniform(k[0], (3 * H, input_size), jnp.float32, -s, s),
        w_hh=jax.random.uniform(k[1], (3 * H, H), jnp.float32, -s, s),
        b_ih=jax.random.uniform(k[2], (3 * H,), jnp.float32, -s, s),
        b_hh=jax.random.uniform(k[3], (3 * H,), jnp.float32, -s, s),
        w_fc=jax.random.uniform(k[4], (out_size, H), jnp.float32, -s, s),
        b_fc=jax.random.uniform(k[5], (out_size,), jnp.float32, -s, s),
    )


if __name__ == "__main__":
    B, T, INPUT, HIDDEN, OUT = 2, 8, 8, 32, 4

    key = jax.random.PRNGKey(0)
    kx, kp = jax.random.split(key)
    x = jax.random.normal(kx, (B, T, INPUT), jnp.float32)
    raw = init_raw_params(kp, INPUT, HIDDEN, OUT)

    # One-time weight packing, hoisted off the forward call path.
    packed = prepare_params(raw, INPUT, HIDDEN, OUT, batch_size=B)

    fwd = jax.jit(model_forward, static_argnums=2)
    y = fwd(x, packed, OUT)
    jax.block_until_ready(y)
    assert y.shape == (B, T, OUT)

    y_ref = model_reference(x, raw)
    err = float(jnp.max(jnp.abs(y - y_ref)))
    assert err < 5e-3, f"mismatch vs reference: {err}"

    print("KERNEL_OK")
</pallas_src>

<mosaic_0001>
module attributes {stable_mosaic.version = 11 : i64} {
  func.func @gru_fc_kernel(%arg0: memref<64x8xf32, #tpu.memory_space<vmem>>, %arg1: memref<8x384xf32, #tpu.memory_space<vmem>>, %arg2: memref<128x384xf32, #tpu.memory_space<vmem>>, %arg3: memref<1x384xf32, #tpu.memory_space<vmem>>, %arg4: memref<1x128xf32, #tpu.memory_space<vmem>>, %arg5: memref<128x128xf32, #tpu.memory_space<vmem>>, %arg6: memref<1x128xf32, #tpu.memory_space<vmem>>, %arg7: memref<8x128xf32, #tpu.memory_space<vmem>>, %arg8: memref<64x128xf32, #tpu.memory_space<vmem>>, %arg9: memref<64x384xf32, #tpu.memory_space<vmem>>) attributes {dimension_semantics = [], scalar_prefetch = 0 : i64, scratch_operands = 1 : i64, tpu.core_type = #tpu.core_type<tc>} {
    %c0 = arith.constant 0 : index
    %c0_0 = arith.constant 0 : index
    %0 = vector.load %arg0[%c0, %c0_0] : memref<64x8xf32, #tpu.memory_space<vmem>>, vector<64x8xf32>
    %c0_1 = arith.constant 0 : index
    %c0_2 = arith.constant 0 : index
    %1 = vector.load %arg1[%c0_1, %c0_2] : memref<8x384xf32, #tpu.memory_space<vmem>>, vector<8x384xf32>
    %cst = arith.constant dense<0.000000e+00> : vector<64x384xf32>
    %2 = tpu.matmul %0, %1, %cst {dimension_numbers = #tpu.dot_dimension_numbers<[1], [0], [0], [1], [0, 0, 1, 1], [], []>} : vector<64x8xf32>, vector<8x384xf32>, vector<64x384xf32> -> vector<64x384xf32>
    %c0_3 = arith.constant 0 : index
    %c0_4 = arith.constant 0 : index
    %3 = vector.load %arg3[%c0_3, %c0_4] : memref<1x384xf32, #tpu.memory_space<vmem>>, vector<1x384xf32>
    %4 = vector.broadcast %3 : vector<1x384xf32> to vector<64x384xf32>
    %5 = arith.addf %2, %4 : vector<64x384xf32>
    %c0_5 = arith.constant 0 : index
    %c0_6 = arith.constant 0 : index
    %6 = vector.load %arg9[%c0_5, %c0_6] : memref<64x384xf32, #tpu.memory_space<vmem>>, vector<64x384xf32>
    tpu.vector_store %arg9[%c0_5, %c0_6], %5 {strides = array<i32>} : memref<64x384xf32, #tpu.memory_space<vmem>>, vector<64x384xf32>,
    %c0_7 = arith.constant 0 : index
    %c0_8 = arith.constant 0 : index
    %7 = vector.load %arg2[%c0_7, %c0_8] : memref<128x384xf32, #tpu.memory_space<vmem>>, vector<128x384xf32>
    %c0_9 = arith.constant 0 : index
    %c0_10 = arith.constant 0 : index
    %8 = vector.load %arg4[%c0_9, %c0_10] : memref<1x128xf32, #tpu.memory_space<vmem>>, vector<1x128xf32>
    %c0_11 = arith.constant 0 : index
    %c0_12 = arith.constant 0 : index
    %9 = vector.load %arg7[%c0_11, %c0_12] : memref<8x128xf32, #tpu.memory_space<vmem>>, vector<8x128xf32>
    %c0_13 = arith.constant 0 : index
    %c0_14 = arith.constant 0 : index
    %10 = vector.load %arg9[%c0_13, %c0_14] : memref<64x384xf32, #tpu.memory_space<vmem>>, vector<8x384xf32>
    %cst_15 = arith.constant dense<0.000000e+00> : vector<8x384xf32>
    %11 = tpu.matmul %9, %7, %cst_15 {dimension_numbers = #tpu.dot_dimension_numbers<[1], [0], [0], [1], [0, 0, 1, 1], [], []>} : vector<8x128xf32>, vector<128x384xf32>, vector<8x384xf32> -> vector<8x384xf32>
    %12 = vector.extract_strided_slice %10 {offsets = [0, 0], sizes = [8, 128], strides = [1, 1]} : vector<8x384xf32> to vector<8x128xf32>
    %13 = vector.extract_strided_slice %11 {offsets = [0, 0], sizes = [8, 128], strides = [1, 1]} : vector<8x384xf32> to vector<8x128xf32>
    %14 = arith.addf %12, %13 : vector<8x128xf32>
    %15 = arith.negf %14 : vector<8x128xf32>
    %16 = math.exp %15 : vector<8x128xf32>
    %cst_16 = arith.constant 1.000000e+00 : f32
    %17 = vector.broadcast %cst_16 : f32 to vector<8x128xf32>
    %18 = arith.addf %17, %16 : vector<8x128xf32>
    %19 = arith.divf %17, %18 : vector<8x128xf32>
    %20 = vector.extract_strided_slice %10 {offsets = [0, 128], sizes = [8, 128], strides = [1, 1]} : vector<8x384xf32> to vector<8x128xf32>
    %21 = vector.extract_strided_slice %11 {offsets = [0, 128], sizes = [8, 128], strides = [1, 1]} : vector<8x384xf32> to vector<8x128xf32>
    %22 = arith.addf %20, %21 : vector<8x128xf32>
    %23 = arith.negf %22 : vector<8x128xf32>
    %24 = math.exp %23 : vector<8x128xf32>
    %cst_17 = arith.constant 1.000000e+00 : f32
    %25 = vector.broadcast %cst_17 : f32 to vector<8x128xf32>
    %26 = arith.addf %25, %24 : vector<8x128xf32>
    %27 = arith.divf %25, %26 : vector<8x128xf32>
    %28 = vector.extract_strided_slice %10 {offsets = [0, 256], sizes = [8, 128], strides = [1, 1]} : vector<8x384xf32> to vector<8x128xf32>
    %29 = vector.extract_strided_slice %11 {offsets = [0, 256], sizes = [8, 128], strides = [1, 1]} : vector<8x384xf32> to vector<8x128xf32>
    %30 = vector.broadcast %8 : vector<1x128xf32> to vector<8x128xf32>
    %31 = arith.addf %29, %30 : vector<8x128xf32>
    %32 = arith.mulf %19, %31 : vector<8x128xf32>
    %33 = arith.addf %28, %32 : vector<8x128xf32>
    %34 = math.tanh %33 : vector<8x128xf32>
    %cst_18 = arith.constant 1.000000e+00 : f32
    %35 = vector.broadcast %cst_18 : f32 to vector<8x128xf32>
    %36 = arith.subf %35, %27 : vector<8x128xf32>
    %37 = arith.mulf %36, %34 : vector<8x128xf32>
    %38 = arith.mulf %27, %9 : vector<8x128xf32>
    %39 = arith.addf %37, %38 : vector<8x128xf32>
    %c8 = arith.constant 8 : index
    %c0_19 = arith.constant 0 : index
    %40 = vector.load %arg9[%c8, %c0_19] : memref<64x384xf32, #tpu.memory_space<vmem>>, vector<8x384xf32>
    %cst_20 = arith.constant dense<0.000000e+00> : vector<8x384xf32>
    %41 = tpu.matmul %39, %7, %cst_20 {dimension_numbers = #tpu.dot_dimension_numbers<[1], [0], [0], [1], [0, 0, 1, 1], [], []>} : vector<8x128xf32>, vector<128x384xf32>, vector<8x384xf32> -> vector<8x384xf32>
    %42 = vector.extract_strided_slice %40 {offsets = [0, 0], sizes = [8, 128], strides = [1, 1]} : vector<8x384xf32> to vector<8x128xf32>
    %43 = vector.extract_strided_slice %41 {offsets = [0, 0], sizes = [8, 128], strides = [1, 1]} : vector<8x384xf32> to vector<8x128xf32>
    %44 = arith.addf %42, %43 : vector<8x128xf32>
    %45 = arith.negf %44 : vector<8x128xf32>
    %46 = math.exp %45 : vector<8x128xf32>
    %cst_21 = arith.constant 1.000000e+00 : f32
    %47 = vector.broadcast %cst_21 : f32 to vector<8x128xf32>
    %48 = arith.addf %47, %46 : vector<8x128xf32>
    %49 = arith.divf %47, %48 : vector<8x128xf32>
    %50 = vector.extract_strided_slice %40 {offsets = [0, 128], sizes = [8, 128], strides = [1, 1]} : vector<8x384xf32> to vector<8x128xf32>
    %51 = vector.extract_strided_slice %41 {offsets = [0, 128], sizes = [8, 128], strides = [1, 1]} : vector<8x384xf32> to vector<8x128xf32>
    %52 = arith.addf %50, %51 : vector<8x128xf32>
    %53 = arith.negf %52 : vector<8x128xf32>
    %54 = math.exp %53 : vector<8x128xf32>
    %cst_22 = arith.constant 1.000000e+00 : f32
    %55 = vector.broadcast %cst_22 : f32 to vector<8x128xf32>
    %56 = arith.addf %55, %54 : vector<8x128xf32>
    %57 = arith.divf %55, %56 : vector<8x128xf32>
    %58 = vector.extract_strided_slice %40 {offsets = [0, 256], sizes = [8, 128], strides = [1, 1]} : vector<8x384xf32> to vector<8x128xf32>
    %59 = vector.extract_strided_slice %41 {offsets = [0, 256], sizes = [8, 128], strides = [1, 1]} : vector<8x384xf32> to vector<8x128xf32>
    %60 = vector.broadcast %8 : vector<1x128xf32> to vector<8x128xf32>
    %61 = arith.addf %59, %60 : vector<8x128xf32>
    %62 = arith.mulf %49, %61 : vector<8x128xf32>
    %63 = arith.addf %58, %62 : vector<8x128xf32>
    %64 = math.tanh %63 : vector<8x128xf32>
    %cst_23 = arith.constant 1.000000e+00 : f32
    %65 = vector.broadcast %cst_23 : f32 to vector<8x128xf32>
    %66 = arith.subf %65, %57 : vector<8x128xf32>
    %67 = arith.mulf %66, %64 : vector<8x128xf32>
    %68 = arith.mulf %57, %39 : vector<8x128xf32>
    %69 = arith.addf %67, %68 : vector<8x128xf32>
    %c16 = arith.constant 16 : index
    %c0_24 = arith.constant 0 : index
    %70 = vector.load %arg9[%c16, %c0_24] : memref<64x384xf32, #tpu.memory_space<vmem>>, vector<8x384xf32>
    %cst_25 = arith.constant dense<0.000000e+00> : vector<8x384xf32>
    %71 = tpu.matmul %69, %7, %cst_25 {dimension_numbers = #tpu.dot_dimension_numbers<[1], [0], [0], [1], [0, 0, 1, 1], [], []>} : vector<8x128xf32>, vector<128x384xf32>, vector<8x384xf32> -> vector<8x384xf32>
    %72 = vector.extract_strided_slice %70 {offsets = [0, 0], sizes = [8, 128], strides = [1, 1]} : vector<8x384xf32> to vector<8x128xf32>
    %73 = vector.extract_strided_slice %71 {offsets = [0, 0], sizes = [8, 128], strides = [1, 1]} : vector<8x384xf32> to vector<8x128xf32>
    %74 = arith.addf %72, %73 : vector<8x128xf32>
    %75 = arith.negf %74 : vector<8x128xf32>
    %76 = math.exp %75 : vector<8x128xf32>
    %cst_26 = arith.constant 1.000000e+00 : f32
    %77 = vector.broadcast %cst_26 : f32 to vector<8x128xf32>
    %78 = arith.addf %77, %76 : vector<8x128xf32>
    %79 = arith.divf %77, %78 : vector<8x128xf32>
    %80 = vector.extract_strided_slice %70 {offsets = [0, 128], sizes = [8, 128], strides = [1, 1]} : vector<8x384xf32> to vector<8x128xf32>
    %81 = vector.extract_strided_slice %71 {offsets = [0, 128], sizes = [8, 128], strides = [1, 1]} : vector<8x384xf32> to vector<8x128xf32>
    %82 = arith.addf %80, %81 : vector<8x128xf32>
    %83 = arith.negf %82 : vector<8x128xf32>
    %84 = math.exp %83 : vector<8x128xf32>
    %cst_27 = arith.constant 1.000000e+00 : f32
    %85 = vector.broadcast %cst_27 : f32 to vector<8x128xf32>
    %86 = arith.addf %85, %84 : vector<8x128xf32>
    %87 = arith.divf %85, %86 : vector<8x128xf32>
    %88 = vector.extract_strided_slice %70 {offsets = [0, 256], sizes = [8, 128], strides = [1, 1]} : vector<8x384xf32> to vector<8x128xf32>
    %89 = vector.extract_strided_slice %71 {offsets = [0, 256], sizes = [8, 128], strides = [1, 1]} : vector<8x384xf32> to vector<8x128xf32>
    %90 = vector.broadcast %8 : vector<1x128xf32> to vector<8x128xf32>
    %91 = arith.addf %89, %90 : vector<8x128xf32>
    %92 = arith.mulf %79, %91 : vector<8x128xf32>
    %93 = arith.addf %88, %92 : vector<8x128xf32>
    %94 = math.tanh %93 : vector<8x128xf32>
    %cst_28 = arith.constant 1.000000e+00 : f32
    %95 = vector.broadcast %cst_28 : f32 to vector<8x128xf32>
    %96 = arith.subf %95, %87 : vector<8x128xf32>
    %97 = arith.mulf %96, %94 : vector<8x128xf32>
    %98 = arith.mulf %87, %69 : vector<8x128xf32>
    %99 = arith.addf %97, %98 : vector<8x128xf32>
    %c24 = arith.constant 24 : index
    %c0_29 = arith.constant 0 : index
    %100 = vector.load %arg9[%c24, %c0_29] : memref<64x384xf32, #tpu.memory_space<vmem>>, vector<8x384xf32>
    %cst_30 = arith.constant dense<0.000000e+00> : vector<8x384xf32>
    %101 = tpu.matmul %99, %7, %cst_30 {dimension_numbers = #tpu.dot_dimension_numbers<[1], [0], [0], [1], [0, 0, 1, 1], [], []>} : vector<8x128xf32>, vector<128x384xf32>, vector<8x384xf32> -> vector<8x384xf32>
    %102 = vector.extract_strided_slice %100 {offsets = [0, 0], sizes = [8, 128], strides = [1, 1]} : vector<8x384xf32> to vector<8x128xf32>
    %103 = vector.extract_strided_slice %101 {offsets = [0, 0], sizes = [8, 128], strides = [1, 1]} : vector<8x384xf32> to vector<8x128xf32>
    %104 = arith.addf %102, %103 : vector<8x128xf32>
    %105 = arith.negf %104 : vector<8x128xf32>
    %106 = math.exp %105 : vector<8x128xf32>
    %cst_31 = arith.constant 1.000000e+00 : f32
    %107 = vector.broadcast %cst_31 : f32 to vector<8x128xf32>
    %108 = arith.addf %107, %106 : vector<8x128xf32>
    %109 = arith.divf %107, %108 : vector<8x128xf32>
    %110 = vector.extract_strided_slice %100 {offsets = [0, 128], sizes = [8, 128], strides = [1, 1]} : vector<8x384xf32> to vector<8x128xf32>
    %111 = vector.extract_strided_slice %101 {offsets = [0, 128], sizes = [8, 128], strides = [1, 1]} : vector<8x384xf32> to vector<8x128xf32>
    %112 = arith.addf %110, %111 : vector<8x128xf32>
    %113 = arith.negf %112 : vector<8x128xf32>
    %114 = math.exp %113 : vector<8x128xf32>
    %cst_32 = arith.constant 1.000000e+00 : f32
    %115 = vector.broadcast %cst_32 : f32 to vector<8x128xf32>
    %116 = arith.addf %115, %114 : vector<8x128xf32>
    %117 = arith.divf %115, %116 : vector<8x128xf32>
    %118 = vector.extract_strided_slice %100 {offsets = [0, 256], sizes = [8, 128], strides = [1, 1]} : vector<8x384xf32> to vector<8x128xf32>
    %119 = vector.extract_strided_slice %101 {offsets = [0, 256], sizes = [8, 128], strides = [1, 1]} : vector<8x384xf32> to vector<8x128xf32>
    %120 = vector.broadcast %8 : vector<1x128xf32> to vector<8x128xf32>
    %121 = arith.addf %119, %120 : vector<8x128xf32>
    %122 = arith.mulf %109, %121 : vector<8x128xf32>
    %123 = arith.addf %118, %122 : vector<8x128xf32>
    %124 = math.tanh %123 : vector<8x128xf32>
    %cst_33 = arith.constant 1.000000e+00 : f32
    %125 = vector.broadcast %cst_33 : f32 to vector<8x128xf32>
    %126 = arith.subf %125, %117 : vector<8x128xf32>
    %127 = arith.mulf %126, %124 : vector<8x128xf32>
    %128 = arith.mulf %117, %99 : vector<8x128xf32>
    %129 = arith.addf %127, %128 : vector<8x128xf32>
    %c32 = arith.constant 32 : index
    %c0_34 = arith.constant 0 : index
    %130 = vector.load %arg9[%c32, %c0_34] : memref<64x384xf32, #tpu.memory_space<vmem>>, vector<8x384xf32>
    %cst_35 = arith.constant dense<0.000000e+00> : vector<8x384xf32>
    %131 = tpu.matmul %129, %7, %cst_35 {dimension_numbers = #tpu.dot_dimension_numbers<[1], [0], [0], [1], [0, 0, 1, 1], [], []>} : vector<8x128xf32>, vector<128x384xf32>, vector<8x384xf32> -> vector<8x384xf32>
    %132 = vector.extract_strided_slice %130 {offsets = [0, 0], sizes = [8, 128], strides = [1, 1]} : vector<8x384xf32> to vector<8x128xf32>
    %133 = vector.extract_strided_slice %131 {offsets = [0, 0], sizes = [8, 128], strides = [1, 1]} : vector<8x384xf32> to vector<8x128xf32>
    %134 = arith.addf %132, %133 : vector<8x128xf32>
    %135 = arith.negf %134 : vector<8x128xf32>
    %136 = math.exp %135 : vector<8x128xf32>
    %cst_36 = arith.constant 1.000000e+00 : f32
    %137 = vector.broadcast %cst_36 : f32 to vector<8x128xf32>
    %138 = arith.addf %137, %136 : vector<8x128xf32>
    %139 = arith.divf %137, %138 : vector<8x128xf32>
    %140 = vector.extract_strided_slice %130 {offsets = [0, 128], sizes = [8, 128], strides = [1, 1]} : vector<8x384xf32> to vector<8x128xf32>
    %141 = vector.extract_strided_slice %131 {offsets = [0, 128], sizes = [8, 128], strides = [1, 1]} : vector<8x384xf32> to vector<8x128xf32>
    %142 = arith.addf %140, %141 : vector<8x128xf32>
    %143 = arith.negf %142 : vector<8x128xf32>
    %144 = math.exp %143 : vector<8x128xf32>
    %cst_37 = arith.constant 1.000000e+00 : f32
    %145 = vector.broadcast %cst_37 : f32 to vector<8x128xf32>
    %146 = arith.addf %145, %144 : vector<8x128xf32>
    %147 = arith.divf %145, %146 : vector<8x128xf32>
    %148 = vector.extract_strided_slice %130 {offsets = [0, 256], sizes = [8, 128], strides = [1, 1]} : vector<8x384xf32> to vector<8x128xf32>
    %149 = vector.extract_strided_slice %131 {offsets = [0, 256], sizes = [8, 128], strides = [1, 1]} : vector<8x384xf32> to vector<8x128xf32>
    %150 = vector.broadcast %8 : vector<1x128xf32> to vector<8x128xf32>
    %151 = arith.addf %149, %150 : vector<8x128xf32>
    %152 = arith.mulf %139, %151 : vector<8x128xf32>
    %153 = arith.addf %148, %152 : vector<8x128xf32>
    %154 = math.tanh %153 : vector<8x128xf32>
    %cst_38 = arith.constant 1.000000e+00 : f32
    %155 = vector.broadcast %cst_38 : f32 to vector<8x128xf32>
    %156 = arith.subf %155, %147 : vector<8x128xf32>
    %157 = arith.mulf %156, %154 : vector<8x128xf32>
    %158 = arith.mulf %147, %129 : vector<8x128xf32>
    %159 = arith.addf %157, %158 : vector<8x128xf32>
    %c40 = arith.constant 40 : index
    %c0_39 = arith.constant 0 : index
    %160 = vector.load %arg9[%c40, %c0_39] : memref<64x384xf32, #tpu.memory_space<vmem>>, vector<8x384xf32>
    %cst_40 = arith.constant dense<0.000000e+00> : vector<8x384xf32>
    %161 = tpu.matmul %159, %7, %cst_40 {dimension_numbers = #tpu.dot_dimension_numbers<[1], [0], [0], [1], [0, 0, 1, 1], [], []>} : vector<8x128xf32>, vector<128x384xf32>, vector<8x384xf32> -> vector<8x384xf32>
    %162 = vector.extract_strided_slice %160 {offsets = [0, 0], sizes = [8, 128], strides = [1, 1]} : vector<8x384xf32> to vector<8x128xf32>
    %163 = vector.extract_strided_slice %161 {offsets = [0, 0], sizes = [8, 128], strides = [1, 1]} : vector<8x384xf32> to vector<8x128xf32>
    %164 = arith.addf %162, %163 : vector<8x128xf32>
    %165 = arith.negf %164 : vector<8x128xf32>
    %166 = math.exp %165 : vector<8x128xf32>
    %cst_41 = arith.constant 1.000000e+00 : f32
    %167 = vector.broadcast %cst_41 : f32 to vector<8x128xf32>
    %168 = arith.addf %167, %166 : vector<8x128xf32>
    %169 = arith.divf %167, %168 : vector<8x128xf32>
    %170 = vector.extract_strided_slice %160 {offsets = [0, 128], sizes = [8, 128], strides = [1, 1]} : vector<8x384xf32> to vector<8x128xf32>
    %171 = vector.extract_strided_slice %161 {offsets = [0, 128], sizes = [8, 128], strides = [1, 1]} : vector<8x384xf32> to vector<8x128xf32>
    %172 = arith.addf %170, %171 : vector<8x128xf32>
    %173 = arith.negf %172 : vector<8x128xf32>
    %174 = math.exp %173 : vector<8x128xf32>
    %cst_42 = arith.constant 1.000000e+00 : f32
    %175 = vector.broadcast %cst_42 : f32 to vector<8x128xf32>
    %176 = arith.addf %175, %174 : vector<8x128xf32>
    %177 = arith.divf %175, %176 : vector<8x128xf32>
    %178 = vector.extract_strided_slice %160 {offsets = [0, 256], sizes = [8, 128], strides = [1, 1]} : vector<8x384xf32> to vector<8x128xf32>
    %179 = vector.extract_strided_slice %161 {offsets = [0, 256], sizes = [8, 128], strides = [1, 1]} : vector<8x384xf32> to vector<8x128xf32>
    %180 = vector.broadcast %8 : vector<1x128xf32> to vector<8x128xf32>
    %181 = arith.addf %179, %180 : vector<8x128xf32>
    %182 = arith.mulf %169, %181 : vector<8x128xf32>
    %183 = arith.addf %178, %182 : vector<8x128xf32>
    %184 = math.tanh %183 : vector<8x128xf32>
    %cst_43 = arith.constant 1.000000e+00 : f32
    %185 = vector.broadcast %cst_43 : f32 to vector<8x128xf32>
    %186 = arith.subf %185, %177 : vector<8x128xf32>
    %187 = arith.mulf %186, %184 : vector<8x128xf32>
    %188 = arith.mulf %177, %159 : vector<8x128xf32>
    %189 = arith.addf %187, %188 : vector<8x128xf32>
    %c48 = arith.constant 48 : index
    %c0_44 = arith.constant 0 : index
    %190 = vector.load %arg9[%c48, %c0_44] : memref<64x384xf32, #tpu.memory_space<vmem>>, vector<8x384xf32>
    %cst_45 = arith.constant dense<0.000000e+00> : vector<8x384xf32>
    %191 = tpu.matmul %189, %7, %cst_45 {dimension_numbers = #tpu.dot_dimension_numbers<[1], [0], [0], [1], [0, 0, 1, 1], [], []>} : vector<8x128xf32>, vector<128x384xf32>, vector<8x384xf32> -> vector<8x384xf32>
    %192 = vector.extract_strided_slice %190 {offsets = [0, 0], sizes = [8, 128], strides = [1, 1]} : vector<8x384xf32> to vector<8x128xf32>
    %193 = vector.extract_strided_slice %191 {offsets = [0, 0], sizes = [8, 128], strides = [1, 1]} : vector<8x384xf32> to vector<8x128xf32>
    %194 = arith.addf %192, %193 : vector<8x128xf32>
    %195 = arith.negf %194 : vector<8x128xf32>
    %196 = math.exp %195 : vector<8x128xf32>
    %cst_46 = arith.constant 1.000000e+00 : f32
    %197 = vector.broadcast %cst_46 : f32 to vector<8x128xf32>
    %198 = arith.addf %197, %196 : vector<8x128xf32>
    %199 = arith.divf %197, %198 : vector<8x128xf32>
    %200 = vector.extract_strided_slice %190 {offsets = [0, 128], sizes = [8, 128], strides = [1, 1]} : vector<8x384xf32> to vector<8x128xf32>
    %201 = vector.extract_strided_slice %191 {offsets = [0, 128], sizes = [8, 128], strides = [1, 1]} : vector<8x384xf32> to vector<8x128xf32>
    %202 = arith.addf %200, %201 : vector<8x128xf32>
    %203 = arith.negf %202 : vector<8x128xf32>
    %204 = math.exp %203 : vector<8x128xf32>
    %cst_47 = arith.constant 1.000000e+00 : f32
    %205 = vector.broadcast %cst_47 : f32 to vector<8x128xf32>
    %206 = arith.addf %205, %204 : vector<8x128xf32>
    %207 = arith.divf %205, %206 : vector<8x128xf32>
    %208 = vector.extract_strided_slice %190 {offsets = [0, 256], sizes = [8, 128], strides = [1, 1]} : vector<8x384xf32> to vector<8x128xf32>
    %209 = vector.extract_strided_slice %191 {offsets = [0, 256], sizes = [8, 128], strides = [1, 1]} : vector<8x384xf32> to vector<8x128xf32>
    %210 = vector.broadcast %8 : vector<1x128xf32> to vector<8x128xf32>
    %211 = arith.addf %209, %210 : vector<8x128xf32>
    %212 = arith.mulf %199, %211 : vector<8x128xf32>
    %213 = arith.addf %208, %212 : vector<8x128xf32>
    %214 = math.tanh %213 : vector<8x128xf32>
    %cst_48 = arith.constant 1.000000e+00 : f32
    %215 = vector.broadcast %cst_48 : f32 to vector<8x128xf32>
    %216 = arith.subf %215, %207 : vector<8x128xf32>
    %217 = arith.mulf %216, %214 : vector<8x128xf32>
    %218 = arith.mulf %207, %189 : vector<8x128xf32>
    %219 = arith.addf %217, %218 : vector<8x128xf32>
    %c56 = arith.constant 56 : index
    %c0_49 = arith.constant 0 : index
    %220 = vector.load %arg9[%c56, %c0_49] : memref<64x384xf32, #tpu.memory_space<vmem>>, vector<8x384xf32>
    %cst_50 = arith.constant dense<0.000000e+00> : vector<8x384xf32>
    %221 = tpu.matmul %219, %7, %cst_50 {dimension_numbers = #tpu.dot_dimension_numbers<[1], [0], [0], [1], [0, 0, 1, 1], [], []>} : vector<8x128xf32>, vector<128x384xf32>, vector<8x384xf32> -> vector<8x384xf32>
    %222 = vector.extract_strided_slice %220 {offsets = [0, 0], sizes = [8, 128], strides = [1, 1]} : vector<8x384xf32> to vector<8x128xf32>
    %223 = vector.extract_strided_slice %221 {offsets = [0, 0], sizes = [8, 128], strides = [1, 1]} : vector<8x384xf32> to vector<8x128xf32>
    %224 = arith.addf %222, %223 : vector<8x128xf32>
    %225 = arith.negf %224 : vector<8x128xf32>
    %226 = math.exp %225 : vector<8x128xf32>
    %cst_51 = arith.constant 1.000000e+00 : f32
    %227 = vector.broadcast %cst_51 : f32 to vector<8x128xf32>
    %228 = arith.addf %227, %226 : vector<8x128xf32>
    %229 = arith.divf %227, %228 : vector<8x128xf32>
    %230 = vector.extract_strided_slice %220 {offsets = [0, 128], sizes = [8, 128], strides = [1, 1]} : vector<8x384xf32> to vector<8x128xf32>
    %231 = vector.extract_strided_slice %221 {offsets = [0, 128], sizes = [8, 128], strides = [1, 1]} : vector<8x384xf32> to vector<8x128xf32>
    %232 = arith.addf %230, %231 : vector<8x128xf32>
    %233 = arith.negf %232 : vector<8x128xf32>
    %234 = math.exp %233 : vector<8x128xf32>
    %cst_52 = arith.constant 1.000000e+00 : f32
    %235 = vector.broadcast %cst_52 : f32 to vector<8x128xf32>
    %236 = arith.addf %235, %234 : vector<8x128xf32>
    %237 = arith.divf %235, %236 : vector<8x128xf32>
    %238 = vector.extract_strided_slice %220 {offsets = [0, 256], sizes = [8, 128], strides = [1, 1]} : vector<8x384xf32> to vector<8x128xf32>
    %239 = vector.extract_strided_slice %221 {offsets = [0, 256], sizes = [8, 128], strides = [1, 1]} : vector<8x384xf32> to vector<8x128xf32>
    %240 = vector.broadcast %8 : vector<1x128xf32> to vector<8x128xf32>
    %241 = arith.addf %239, %240 : vector<8x128xf32>
    %242 = arith.mulf %229, %241 : vector<8x128xf32>
    %243 = arith.addf %238, %242 : vector<8x128xf32>
    %244 = math.tanh %243 : vector<8x128xf32>
    %cst_53 = arith.constant 1.000000e+00 : f32
    %245 = vector.broadcast %cst_53 : f32 to vector<8x128xf32>
    %246 = arith.subf %245, %237 : vector<8x128xf32>
    %247 = arith.mulf %246, %244 : vector<8x128xf32>
    %248 = arith.mulf %237, %219 : vector<8x128xf32>
    %249 = arith.addf %247, %248 : vector<8x128xf32>
    %250 = tpu.concatenate %39, %69, %99, %129, %159, %189, %219, %249 in 0 : vector<8x128xf32>, vector<8x128xf32>, vector<8x128xf32>, vector<8x128xf32>, vector<8x128xf32>, vector<8x128xf32>, vector<8x128xf32>, vector<8x128xf32> -> vector<64x128xf32>
    %c0_54 = arith.constant 0 : index
    %c0_55 = arith.constant 0 : index
    %251 = vector.load %arg5[%c0_54, %c0_55] : memref<128x128xf32, #tpu.memory_space<vmem>>, vector<128x128xf32>
    %cst_56 = arith.constant dense<0.000000e+00> : vector<64x128xf32>
    %252 = tpu.matmul %250, %251, %cst_56 {dimension_numbers = #tpu.dot_dimension_numbers<[1], [0], [0], [1], [0, 0, 1, 1], [], []>} : vector<64x128xf32>, vector<128x128xf32>, vector<64x128xf32> -> vector<64x128xf32>
    %c0_57 = arith.constant 0 : index
    %c0_58 = arith.constant 0 : index
    %253 = vector.load %arg6[%c0_57, %c0_58] : memref<1x128xf32, #tpu.memory_space<vmem>>, vector<1x128xf32>
    %254 = vector.broadcast %253 : vector<1x128xf32> to vector<64x128xf32>
    %255 = arith.addf %252, %254 : vector<64x128xf32>
    %c0_59 = arith.constant 0 : index
    %c0_60 = arith.constant 0 : index
    %256 = vector.load %arg8[%c0_59, %c0_60] : memref<64x128xf32, #tpu.memory_space<vmem>>, vector<64x128xf32>
    tpu.vector_store %arg8[%c0_59, %c0_60], %255 {strides = array<i32>} : memref<64x128xf32, #tpu.memory_space<vmem>>, vector<64x128xf32>,
    return
  }
}

</mosaic_0001>

<bundles_post_ra>
// kernel: model_forward.1
= control target key start
LH: loop header
LB: loop body
LE: loop exit
PB: predicated region body
PF: predicated region fallthrough
CT: control target
= control target key end

     0   :  { %13 = vsyncpa [#allocation4], 0  ;;  %s1452_s30 = smov [#allocation3]   ;;  %s1453_s10 = smov 384   ;;  %s2390_s0 = inlined_call_operand.vmem [shape: f32[64,8], index: 0, kind: input, shape index: {}]   ;;  %s2391_s1 = inlined_call_operand.vmem [shape: f32[8,384], index: 1, kind: input, shape index: {}]   ;;  %s2392_s2 = inlined_call_operand.hbm [shape: f32[128,384], index: 2, kind: input, shape index: {}]   ;;  %s2393_s3 = inlined_call_operand.vmem [shape: f32[1,384], index: 3, kind: input, shape index: {}]   ;;  %s2394_s4 = inlined_call_operand.vmem [shape: f32[1,128], index: 4, kind: input, shape index: {}]   ;;  %s2395_s5 = inlined_call_operand.vmem [shape: f32[128,128], index: 5, kind: input, shape index: {}]   ;;  %s2396_s6 = inlined_call_operand.vmem [shape: f32[1,128], index: 6, kind: input, shape index: {}]   ;;  %s2397_s7 = inlined_call_operand.vmem [shape: f32[8,128], index: 7, kind: input, shape index: {}]   ;;  %s2398_s8 = inlined_call_operand.vmem [shape: f32[64,128], index: 8, kind: output, shape index: {}]  }
   0x1   :  { %s22_s29 = sshll.u32 %s2392_s2, 4  ;;  %s24_s9 = sshll.u32 %s1452_s30, 4  ;;  %s23_s29 = int_to_ptr.hbm [resolvable:$true] %s22_s29  ;;  %s25_s9 = int_to_ptr.vmem [resolvable:$true] %s24_s9 }
   0x2   :  { %s1454_s11 = smov 24  }
   0x3   :  { %30 = dma.hbm_to_vmem [thread:$0]  %s23_s29, 6144, %s25_s9, [#allocation4], %s1453_s10, %s1453_s10, %s1454_s11  }
   0x4   :  { %1450 = dma.done.wait [#allocation4], 6144  }
   0x5   :  { %1451 = vsyncadd [#allocation4], 4294961152  ;;  %vm64_vm0 = vcmask 64512   ;;  %v55_v0 = vld [vmem:[%s2391_s1 + $0x10] sm:$0xff]  ;;  %v1509_v1 = vld [vmem:[%s2390_s0 + $0x20] sm:$0xff] }
   0x6   :  { %v1511_v2 = vld [vmem:[#allocation3 + $0x168] sm:$0xff]  ;;  %1291 = vmatpush.msra.mxu3 %v55_v0  ;;  %v53_v3 = vld [vmem:[%s2391_s1] sm:$0xff]  ;;  %186 = vmatpush.msra.mxu2 %v55_v0  ;;  %v1523_v5 = vld [vmem:[#allocation3 + $0x150] sm:$0xff] }
   0x7   :  { %v1519_v4 = vld [vmem:[%s2390_s0] sm:$0xff]  ;;  %1271 = vmatmul.msk.f32.vlgmr.msra.gmra.mxu3 %vm64_vm0, %v1509_v1  ;;  %104 = vmatpush.msra.mxu0 %v53_v3  ;;  %v1528_v6 = vld [vmem:[#allocation3 + $0x138] sm:$0xff]  ;;  %v1541_v9 = vld [vmem:[%s2390_s0 + $0x28] sm:$0xff] }
   0x8   :  { %289 = vmatpush.msrb.mxu3 %v1511_v2  ;;  %1251 = vmatmul.msk.f32.vlgmr.msra.gmra.mxu0 %vm64_vm0, %v1519_v4  ;;  %v1533_v7 = vld [vmem:[#allocation3 + $0x120] sm:$0xff]  ;;  %v1535_v8 = vld [vmem:[#allocation3 + $0x178] sm:$0xff]  ;;  %v1544_v10 = vld [vmem:[#allocation3 + $0x108] sm:$0xff] }
   0x9   :  { %1267 = vmatmul.msk.f32.vlgmr.msra.gmra.mxu2 %vm64_vm0, %v1519_v4  ;;  %329 = vmatpush.msrb.mxu0 %v1535_v8  ;;  %v1549_v11 = vld [vmem:[%s2390_s0 + $0x8] sm:$0xff]  ;;  %v1551_v12 = vld [vmem:[#allocation3 + $0x160] sm:$0xff]  ;;  %v1555_v13 = vld [vmem:[#allocation3 + $0x170] sm:$0xff] }
   0xa   :  { %290 = vmatpush.msrb.mxu3 %v1523_v5  ;;  %v1557_v14 = vld [vmem:[#allocation3 + $0x148] sm:$0xff]  ;;  %v1561_v15 = vld [vmem:[#allocation3 + $0xf0] sm:$0xff]  ;;  %423 = vmatpush.msrb.mxu2 %v1555_v13  ;;  %v1567_v16 = vld [vmem:[#allocation3 + $0x158] sm:$0xff] }
   0xb   :  { %330 = vmatpush.msrb.mxu0 %v1551_v12  ;;  %v1569_v17 = vld [vmem:[#allocation3 + $0x130] sm:$0xff]  ;;  %v1571_v18 = vld [vmem:[#allocation3 + $0xd8] sm:$0xff]  ;;  %v1574_v19 = vld [vmem:[#allocation3 + $0x140] sm:$0xff] }
   0xc   :  { %291 = vmatpush.msrb.mxu3 %v1528_v6  ;;  %424 = vmatpush.msrb.mxu2 %v1567_v16  ;;  %v1578_v20 = vld [vmem:[#allocation3 + $0x118] sm:$0xff]  ;;  %v1582_v21 = vld [vmem:[#allocation3 + $0xc0] sm:$0xff]  ;;  %v1590_v22 = vld [vmem:[%s2390_s0 + $0x30] sm:$0xff] }
   0xd   :  { %331 = vmatpush.msrb.mxu0 %v1557_v14  ;;  %v1592_v23 = vld [vmem:[#allocation3 + $0x128] sm:$0xff]  ;;  %v1594_v24 = vld [vmem:[#allocation3 + $0x100] sm:$0xff]  ;;  %v1601_v26 = vld [vmem:[%s2390_s0 + $0x10] sm:$0xff] }
   0xe   :  { %292 = vmatpush.msrb.mxu3 %v1533_v7  ;;  %425 = vmatpush.msrb.mxu2 %v1574_v19  ;;  %v1596_v25 = vld [vmem:[#allocation3 + $0xa8] sm:$0xff]  ;;  %v1610_v28 = vld [vmem:[#allocation3 + $0x90] sm:$0xff]  ;;  %v1620_v31 = vld [vmem:[#allocation3 + $0x78] sm:$0xff] }
   0xf   :  { %1272 = vmatmul.msk.f32.gmra.mxu3 %vm64_vm0, %v1541_v9  ;;  %332 = vmatpush.msrb.mxu0 %v1569_v17  ;;  %v1606_v27 = vld [vmem:[#allocation3 + $0xe8] sm:$0xff]  ;;  %v1616_v29 = vld [vmem:[#allocation3 + $0x110] sm:$0xff]  ;;  %v1625_v32 = vld [vmem:[#allocation3 + $0xf8] sm:$0xff] }
  0x10   :  { %293 = vmatpush.msrb.mxu3 %v1544_v10  ;;  %1252 = vmatmul.msk.f32.gmra.mxu0 %vm64_vm0, %v1549_v11  ;;  %v1618_v30 = vld [vmem:[#allocation3 + $0xd0] sm:$0xff]  ;;  %v1627_v33 = vld [vmem:[#allocation3 + $0xb8] sm:$0xff]  ;;  %v1631_v34 = vld [vmem:[#allocation3 + $0x60] sm:$0xff] }
  0x11   :  { %1268 = vmatmul.msk.f32.gmra.mxu2 %vm64_vm0, %v1549_v11  ;;  %333 = vmatpush.msrb.mxu0 %v1578_v20  ;;  %v1639_v35 = vld [vmem:[%s2390_s0 + $0x38] sm:$0xff]  ;;  %v1641_v36 = vld [vmem:[#allocation3 + $0xe0] sm:$0xff]  ;;  %v1645_v38 = vld [vmem:[#allocation3 + $0x48] sm:$0xff] }
  0x12   :  { %294 = vmatpush.msrb.mxu3 %v1561_v15  ;;  %426 = vmatpush.msrb.mxu2 %v1592_v23  ;;  %v1643_v37 = vld [vmem:[#allocation3 + $0xa0] sm:$0xff]  ;;  %v1650_v39 = vld [vmem:[%s2390_s0 + $0x18] sm:$0xff]  ;;  %v1655_v40 = vld [vmem:[#allocation3 + $0x88] sm:$0xff] }
  0x13   :  { %334 = vmatpush.msrb.mxu0 %v1594_v24  ;;  %v1659_v41 = vld [vmem:[#allocation3 + $0x30] sm:$0xff]  ;;  %v1665_v42 = vld [vmem:[#allocation3 + $0xc8] sm:$0xff]  ;;  %v1669_v44 = vld [vmem:[#allocation3 + $0x18] sm:$0xff] }
  0x14   :  { %295 = vmatpush.msrb.mxu3 %v1571_v18  ;;  %427 = vmatpush.msrb.mxu2 %v1616_v29  ;;  %2421 = vst [vmem:[#allocation6_spill] sm:$0xff] %v1659_v41  ;;  %v1667_v43 = vld [vmem:[#allocation3 + $0x70] sm:$0xff]  ;;  %v1676_v46 = vld [vmem:[#allocation3 + $0x58] sm:$0xff]  ;;  %v1680_v47 = vld [vmem:[#allocation3] sm:$0xff] }
  0x15   :  { %335 = vmatpush.msrb.mxu0 %v1606_v27  ;;  %2422 = vst [vmem:[#allocation7_spill] sm:$0xff] %v1669_v44  ;;  %v1674_v45 = vld [vmem:[#allocation3 + $0xb0] sm:$0xff]  ;;  %v1685_v48 = vld [vmem:[#allocation3 + $0x98] sm:$0xff]  ;;  %v1687_v49 = vld [vmem:[#allocation3 + $0x40] sm:$0xff] }
  0x16   :  { %296 = vmatpush.msrb.mxu3 %v1582_v21  ;;  %428 = vmatpush.msrb.mxu2 %v1625_v32  ;;  %2423 = vst [vmem:[#allocation8_spill] sm:$0xff] %v1680_v47  ;;  %v1692_v50 = vld [vmem:[%s2397_s7] sm:$0xff]  ;;  %v1697_v51 = vld [vmem:[#allocation3 + $0x28] sm:$0xff]  ;;  %v1707_v53 = vld [vmem:[#allocation3 + $0x10] sm:$0xff] }
  0x17   :  { %1273 = vmatmul.msk.f32.gmra.mxu3 %vm64_vm0, %v1590_v22  ;;  %336 = vmatpush.msrb.mxu0 %v1618_v30  ;;  %2424 = vst [vmem:[#allocation9_spill] sm:$0xff] %v1687_v49  ;;  %v54_v52 = vld [vmem:[%s2391_s1 + $0x8] sm:$0xff]  ;;  %v1710_v54 = vld [vmem:[#allocation3 + $0x80] sm:$0xff]  ;;  %v1722_v56 = vld [vmem:[#allocation3 + $0x50] sm:$0xff] }
  0x18   :  { %297 = vmatpush.msrb.mxu3 %v1596_v25  ;;  %1253 = vmatmul.msk.f32.gmra.mxu0 %vm64_vm0, %v1601_v26  ;;  %2425 = vst [vmem:[#allocation10_spill] sm:$0xff] %v1697_v51  ;;  %v1715_v55 = vld [vmem:[#allocation3 + $0x68] sm:$0xff]  ;;  %v1728_v57 = vld [vmem:[#allocation3 + $0x38] sm:$0xff]  ;;  %v1735_v58 = vld [vmem:[#allocation3 + $0x20] sm:$0xff] }
  0x19   :  { %1269 = vmatmul.msk.f32.gmra.mxu2 %vm64_vm0, %v1601_v26  ;;  %337 = vmatpush.msrb.mxu0 %v1627_v33  ;;  %2426 = vst [vmem:[#allocation11_spill] sm:$0xff] %v1707_v53  ;;  %v1741_v59 = vld [vmem:[#allocation3 + $0x8] sm:$0xff]  ;;  %v56_v61 = vld [vmem:[%s2393_s3] sm:$0x7] }
  0x1a   :  { %298 = vmatpush.msrb.mxu3 %v1610_v28  ;;  %429 = vmatpush.msrb.mxu2 %v1641_v36  ;;  %2427 = vst [vmem:[#allocation12_spill] sm:$0xff] %v1722_v56  ;;  %v58_v63 = vperm.slane %v56_v61, 0 }
  0x1b   :  { %338 = vmatpush.msrb.mxu0 %v1643_v37  ;;  %145 = vmatpush.msra.mxu1 %v54_v52  ;;  %2428 = vst [vmem:[#allocation13_spill] sm:$0xff] %v1728_v57 }
  0x1c   :  { %299 = vmatpush.msrb.mxu3 %v1620_v31  ;;  %430 = vmatpush.msrb.mxu2 %v1665_v42  ;;  %2429 = vst [vmem:[#allocation14_spill] sm:$0xff] %v1735_v58 }
  0x1d   :  { %339 = vmatpush.msrb.mxu0 %v1655_v40  ;;  %1259 = vmatmul.msk.f32.vlgmr.msra.gmra.mxu1 %vm64_vm0, %v1519_v4  ;;  %2430 = vst [vmem:[#allocation15_spill] sm:$0xff] %v1741_v59 }
  0x1e   :  { %300 = vmatpush.msrb.mxu3 %v1631_v34  ;;  %431 = vmatpush.msrb.mxu2 %v1674_v45 }
  0x1f   :  { %1274 = vmatmul.msk.f32.gmra.mxu3 %vm64_vm0, %v1639_v35  ;;  %340 = vmatpush.msrb.mxu0 %v1667_v43 }
  0x20   :  { %301 = vmatpush.msrb.mxu3 %v1645_v38  ;;  %1254 = vmatmul.msk.f32.gmra.mxu0 %vm64_vm0, %v1650_v39 }
  0x21   :  { %1270 = vmatmul.msk.f32.gmra.mxu2 %vm64_vm0, %v1650_v39  ;;  %341 = vmatpush.msrb.mxu0 %v1676_v46 }
  0x22   :  { %302 = vmatpush.msrb.mxu3 %v1659_v41  ;;  %432 = vmatpush.msrb.mxu2 %v1685_v48 }
  0x23   :  { %342 = vmatpush.msrb.mxu0 %v1687_v49  ;;  %403 = vmatpush.msrb.mxu1 %v1511_v2 }
  0x24   :  { %303 = vmatpush.msrb.mxu3 %v1669_v44  ;;  %433 = vmatpush.msrb.mxu2 %v1710_v54 }
  0x25   :  { %343 = vmatpush.msrb.mxu0 %v1697_v51  ;;  %404 = vmatpush.msrb.mxu1 %v1523_v5 }
  0x26   :  { %304 = vmatpush.msrb.mxu3 %v1680_v47  ;;  %434 = vmatpush.msrb.mxu2 %v1715_v55 }
  0x27   :  { %305 = vmatmul.f32.vlgmr.msrb.gmra.mxu3 %v1692_v50  ;;  %344 = vmatpush.msrb.mxu0 %v1707_v53 }
  0x28   :  { %309 = vmatpush.msra.mxu3 %v1555_v13  ;;  %1255 = vmatmul.msk.f32.gmra.mxu0 %vm64_vm0, %v1509_v1 }
  0x29   :  { %435 = vmatpush.msrb.mxu2 %v1722_v56  ;;  %514 = vmatpush.msra.mxu0 %v1511_v2 }
  0x2a   :  { %310 = vmatpush.msra.mxu3 %v1567_v16  ;;  %405 = vmatpush.msrb.mxu1 %v1528_v6 }
  0x2b   :  { %436 = vmatpush.msrb.mxu2 %v1728_v57  ;;  %515 = vmatpush.msra.mxu0 %v1523_v5 }
  0x2c   :  { %311 = vmatpush.msra.mxu3 %v1574_v19  ;;  %406 = vmatpush.msrb.mxu1 %v1533_v7 }
  0x2d   :  { %437 = vmatpush.msrb.mxu2 %v1735_v58  ;;  %1260 = vmatmul.msk.f32.gmra.mxu1 %vm64_vm0, %v1549_v11 }
  0x2e   :  { %312 = vmatpush.msra.mxu3 %v1592_v23  ;;  %407 = vmatpush.msrb.mxu1 %v1544_v10 }
  0x2f   :  { %438 = vmatpush.msrb.mxu2 %v1741_v59  ;;  %516 = vmatpush.msra.mxu0 %v1528_v6 }
  0x30   :  { %313 = vmatpush.msra.mxu3 %v1616_v29  ;;  %1256 = vmatmul.msk.f32.gmra.mxu0 %vm64_vm0, %v1541_v9 }
  0x31   :  { %554 = vmatpush.msra.mxu2 %v1535_v8  ;;  %408 = vmatpush.msrb.mxu1 %v1561_v15 }
  0x32   :  { %314 = vmatpush.msra.mxu3 %v1625_v32  ;;  %517 = vmatpush.msra.mxu0 %v1533_v7 }
  0x33   :  { %555 = vmatpush.msra.mxu2 %v1551_v12  ;;  %409 = vmatpush.msrb.mxu1 %v1571_v18 }
  0x34   :  { %315 = vmatpush.msra.mxu3 %v1641_v36  ;;  %518 = vmatpush.msra.mxu0 %v1544_v10 }
  0x35   :  { %556 = vmatpush.msra.mxu2 %v1557_v14  ;;  %410 = vmatpush.msrb.mxu1 %v1582_v21 }
  0x36   :  { %316 = vmatpush.msra.mxu3 %v1665_v42  ;;  %1261 = vmatmul.msk.f32.gmra.mxu1 %vm64_vm0, %v1601_v26 }
  0x37   :  { %557 = vmatpush.msra.mxu2 %v1569_v17  ;;  %411 = vmatpush.msrb.mxu1 %v1596_v25 }
  0x38   :  { %317 = vmatpush.msra.mxu3 %v1674_v45  ;;  %1257 = vmatmul.msk.f32.gmra.mxu0 %vm64_vm0, %v1590_v22 }
  0x39   :  { %558 = vmatpush.msra.mxu2 %v1578_v20  ;;  %412 = vmatpush.msrb.mxu1 %v1610_v28 }
  0x3a   :  { %318 = vmatpush.msra.mxu3 %v1685_v48  ;;  %519 = vmatpush.msra.mxu0 %v1561_v15 }
  0x3b   :  { %559 = vmatpush.msra.mxu2 %v1594_v24  ;;  %413 = vmatpush.msrb.mxu1 %v1620_v31 }
  0x3c   :  { %319 = vmatpush.msra.mxu3 %v1710_v54  ;;  %520 = vmatpush.msra.mxu0 %v1571_v18 }
  0x3d   :  { %560 = vmatpush.msra.mxu2 %v1606_v27  ;;  %414 = vmatpush.msrb.mxu1 %v1631_v34 }
  0x3e   :  { %320 = vmatpush.msra.mxu3 %v1715_v55  ;;  %1262 = vmatmul.msk.f32.gmra.mxu1 %vm64_vm0, %v1650_v39 }
  0x3f   :  { %415 = vmatpush.msrb.mxu1 %v1645_v38  ;;  %521 = vmatpush.msra.mxu0 %v1582_v21 }
  0x40   :  { %321 = vmatpush.msra.mxu3 %v1722_v56  ;;  %1258 = vmatmul.msk.f32.gmra.mxu0 %vm64_vm0, %v1639_v35 }
  0x41   :  { %416 = vmatpush.msrb.mxu1 %v1659_v41  ;;  %561 = vmatpush.msra.mxu2 %v1618_v30 }
  0x42   :  { %322 = vmatpush.msra.mxu3 %v1728_v57  ;;  %522 = vmatpush.msra.mxu0 %v1596_v25 }
  0x43   :  { %417 = vmatpush.msrb.mxu1 %v1669_v44  ;;  %562 = vmatpush.msra.mxu2 %v1627_v33 }
  0x44   :  { %323 = vmatpush.msra.mxu3 %v1735_v58  ;;  %523 = vmatpush.msra.mxu0 %v1610_v28 }
  0x45   :  { %418 = vmatpush.msrb.mxu1 %v1680_v47  ;;  %563 = vmatpush.msra.mxu2 %v1643_v37 }
  0x46   :  { %324 = vmatpush.msra.mxu3 %v1741_v59  ;;  %1263 = vmatmul.msk.f32.gmra.mxu1 %vm64_vm0, %v1509_v1 }
  0x47   :  { %325 = vmatmul.f32.vlgmr.msra.gmra.mxu3 %v1692_v50  ;;  %534 = vmatpush.msra.mxu1 %v1555_v13 }
  0x48   :  { %443 = vmatpush.msrb.mxu3 %v1535_v8  ;;  %345 = vmatmul.f32.vlgmr.msrb.gmra.mxu0 %v1692_v50 }
  0x49   :  { %524 = vmatpush.msra.mxu0 %v1620_v31  ;;  %535 = vmatpush.msra.mxu1 %v1567_v16 }
  0x4a   :  { %444 = vmatpush.msrb.mxu3 %v1551_v12  ;;  %564 = vmatpush.msra.mxu2 %v1655_v40 }
  0x4b   :  { %525 = vmatpush.msra.mxu0 %v1631_v34  ;;  %536 = vmatpush.msra.mxu1 %v1574_v19 }
  0x4c   :  { %445 = vmatpush.msrb.mxu3 %v1557_v14  ;;  %565 = vmatpush.msra.mxu2 %v1667_v43 }
  0x4d   :  { %526 = vmatpush.msra.mxu0 %v1645_v38  ;;  %537 = vmatpush.msra.mxu1 %v1592_v23 }
  0x4e   :  { %446 = vmatpush.msrb.mxu3 %v1569_v17  ;;  %1264 = vmatmul.msk.f32.gmra.mxu1 %vm64_vm0, %v1541_v9 }
  0x4f   :  { %566 = vmatpush.msra.mxu2 %v1676_v46  ;;  %538 = vmatpush.msra.mxu1 %v1616_v29 }
  0x50   :  { %447 = vmatpush.msrb.mxu3 %v1578_v20  ;;  %527 = vmatpush.msra.mxu0 %v1659_v41 }
  0x51   :  { %567 = vmatpush.msra.mxu2 %v1687_v49  ;;  %539 = vmatpush.msra.mxu1 %v1625_v32 }
  0x52   :  { %448 = vmatpush.msrb.mxu3 %v1594_v24  ;;  %528 = vmatpush.msra.mxu0 %v1669_v44 }
  0x53   :  { %568 = vmatpush.msra.mxu2 %v1697_v51  ;;  %540 = vmatpush.msra.mxu1 %v1641_v36 }
  0x54   :  { %449 = vmatpush.msrb.mxu3 %v1606_v27  ;;  %529 = vmatpush.msra.mxu0 %v1680_v47 }
  0x55   :  { %569 = vmatpush.msra.mxu2 %v1707_v53  ;;  %541 = vmatpush.msra.mxu1 %v1665_v42 }
  0x56   :  { %450 = vmatpush.msrb.mxu3 %v1618_v30  ;;  %1265 = vmatmul.msk.f32.gmra.mxu1 %vm64_vm0, %v1590_v22 }
  0x57   :  { %645 = vmatpush.msrb.mxu0 %v1555_v13  ;;  %542 = vmatpush.msra.mxu1 %v1674_v45 }
  0x58   :  { %451 = vmatpush.msrb.mxu3 %v1627_v33 }
  0x59   :  { %646 = vmatpush.msrb.mxu0 %v1567_v16  ;;  %543 = vmatpush.msra.mxu1 %v1685_v48 }
  0x5a   :  { %452 = vmatpush.msrb.mxu3 %v1643_v37 }
  0x5b   :  { %647 = vmatpush.msrb.mxu0 %v1574_v19  ;;  %544 = vmatpush.msra.mxu1 %v1710_v54 }
  0x5c   :  { %453 = vmatpush.msrb.mxu3 %v1655_v40 }
  0x5d   :  { %648 = vmatpush.msrb.mxu0 %v1592_v23  ;;  %545 = vmatpush.msra.mxu1 %v1715_v55 }
  0x5e   :  { %454 = vmatpush.msrb.mxu3 %v1667_v43  ;;  %1266 = vmatmul.msk.f32.gmra.mxu1 %vm64_vm0, %v1639_v35 }
  0x5f   :  { %649 = vmatpush.msrb.mxu0 %v1616_v29  ;;  %546 = vmatpush.msra.mxu1 %v1722_v56 }
  0x60   :  { %455 = vmatpush.msrb.mxu3 %v1676_v46 }
  0x61   :  { %650 = vmatpush.msrb.mxu0 %v1625_v32  ;;  %547 = vmatpush.msra.mxu1 %v1728_v57 }
  0x62   :  { %456 = vmatpush.msrb.mxu3 %v1687_v49 }
  0x63   :  { %651 = vmatpush.msrb.mxu0 %v1641_v36  ;;  %548 = vmatpush.msra.mxu1 %v1735_v58 }
  0x64   :  { %457 = vmatpush.msrb.mxu3 %v1697_v51 }
  0x65   :  { %652 = vmatpush.msrb.mxu0 %v1665_v42  ;;  %549 = vmatpush.msra.mxu1 %v1741_v59 }
  0x66   :  { %458 = vmatpush.msrb.mxu3 %v1707_v53 }
  0x67   :  { %653 = vmatpush.msrb.mxu0 %v1674_v45 }
  0x68   :  { %625 = vmatpush.msra.mxu3 %v1511_v2 }
  0x69   :  { %654 = vmatpush.msrb.mxu0 %v1685_v48 }
  0x6a   :  { %626 = vmatpush.msra.mxu3 %v1523_v5 }
  0x6b   :  { %655 = vmatpush.msrb.mxu0 %v1710_v54 }
  0x6c   :  { %627 = vmatpush.msra.mxu3 %v1528_v6 }
  0x6d   :  { %656 = vmatpush.msrb.mxu0 %v1715_v55 }
  0x6e   :  { %628 = vmatpush.msra.mxu3 %v1533_v7 }
  0x6f   :  { %657 = vmatpush.msrb.mxu0 %v1722_v56 }
  0x70   :  { %629 = vmatpush.msra.mxu3 %v1544_v10 }
  0x71   :  { %658 = vmatpush.msrb.mxu0 %v1728_v57 }
  0x72   :  { %630 = vmatpush.msra.mxu3 %v1561_v15 }
  0x73   :  { %659 = vmatpush.msrb.mxu0 %v1735_v58 }
  0x74   :  { %631 = vmatpush.msra.mxu3 %v1571_v18 }
  0x75   :  { %660 = vmatpush.msrb.mxu0 %v1741_v59 }
  0x76   :  { %632 = vmatpush.msra.mxu3 %v1582_v21 }
  0x78   :  { %633 = vmatpush.msra.mxu3 %v1596_v25 }
  0x7a   :  { %634 = vmatpush.msra.mxu3 %v1610_v28 }
  0x7c   :  { %635 = vmatpush.msra.mxu3 %v1620_v31 }
  0x7e   :  { %636 = vmatpush.msra.mxu3 %v1631_v34 }
  0x80   :  { %637 = vmatpush.msra.mxu3 %v1645_v38 }
  0x82   :  { %638 = vmatpush.msra.mxu3 %v1659_v41 }
  0x84   :  { %639 = vmatpush.msra.mxu3 %v1669_v44 }
  0x85   :  { %v106_v60 = vpop.f32.mrf.mxu0 }
  0x86   :  { %640 = vmatpush.msra.mxu3 %v1680_v47 }
  0x8a   :  { %v1883_v62 = vpop.f32.mrf.mxu3 }
  0x8b   :  { %2431 = vst [vmem:[#allocation16_spill] sm:$0xff] %v1883_v62  ;;  %v107_v62 = vadd.f32 %v106_v60, %v58_v63 }
  0x8d   :  { %v109_v0 = vpop.f32.mrf.mxu0 }
  0x8e   :  { %v1885_v1 = vadd.f32 %v109_v0, %v58_v63 }
  0x90   :  { %2432 = vst [vmem:[#allocation17_spill] sm:$0xff] %v1885_v1 }
  0x92   :  { %v1887_v3 = vpop.f32.mrf.mxu3 }
  0x93   :  { %2433 = vst [vmem:[#allocation18_spill] sm:$0xff] %v1887_v3 }
  0x95   :  { %v112_v4 = vpop.f32.mrf.mxu0 }
  0x96   :  { %v1889_v9 = vadd.f32 %v112_v4, %v58_v63 }
  0x98   :  { %2434 = vst [vmem:[#allocation19_spill] sm:$0xff] %v1889_v9 }
  0x9a   :  { %v1891_v11 = vpop.f32.mrf.mxu3  ;;  %v147_v60 = vpop.f32.mrf.mxu1 }
  0x9b   :  { %2435 = vst [vmem:[#allocation20_spill] sm:$0xff] %v1891_v11 }
  0x9d   :  { %v115_v22 = vpop.f32.mrf.mxu0 }
  0x9e   :  { %v1893_v26 = vadd.f32 %v115_v22, %v58_v63 }
  0xa0   :  { %2436 = vst [vmem:[#allocation21_spill] sm:$0xff] %v1893_v26 }
  0xa2   :  { %v1895_v35 = vpop.f32.mrf.mxu3 }
  0xa3   :  { %2437 = vst [vmem:[#allocation22_spill] sm:$0xff] %v1895_v35  ;;  %v1905_v35 = vperm.slane %v56_v61, 1 }
  0xa5   :  { %v118_v39 = vpop.f32.mrf.mxu0  ;;  %2442 = vst [vmem:[#allocation27_spill] sm:$0xff] %v1905_v35 }
  0xa6   :  { %v1897_v52 = vadd.f32 %v118_v39, %v58_v63 }
  0xa8   :  { %2438 = vst [vmem:[#allocation23_spill] sm:$0xff] %v1897_v52 }
  0xaa   :  { %v306_v59 = vpop.f32.mrf.mxu3 }
  0xab   :  { %v349_v47 = vadd.f32 %v306_v59, %v107_v62  ;;  %v148_v59 = vadd.f32 %v147_v60, %v1905_v35 }
  0xad   :  { %v121_v0 = vpop.f32.mrf.mxu0  ;;  %v1275_v1 = vmul.f32 -1.442695, %v349_v47 }
  0xae   :  { %v1899_v53 = vadd.f32 %v121_v0, %v58_v63 }
  0xaf   :  { %1297 = vpow2.f32 %v1275_v1 }
  0xb0   :  { %2439 = vst [vmem:[#allocation24_spill] sm:$0xff] %v1899_v53 }
  0xb5   :  { %v124_v4 = vpop.f32.mrf.mxu0  ;;  %v1298_v3 = vpop.eup %1297 }
  0xb6   :  { %v1901_v9 = vadd.f32 %v124_v4, %v58_v63  ;;  %v353_v11 = vadd.f32 1.0, %v1298_v3 }
  0xb8   :  { %2440 = vst [vmem:[#allocation25_spill] sm:$0xff] %v1901_v9  ;;  %1299 = vrcp.f32 %v353_v11  ;;  %v365_v3 = vand.u32 2147483648, %v353_v11  ;;  %vm359_vm2 = vweird.f32 %v353_v11  ;;  %v363_v9 = vand.u32 2147483647, %v353_v11 }
  0xba   :  { %vm364_vm4 = vcmp.eq.f32.partialorder %v363_v9, 8.507059e+37 }
  0xbd   :  { %v127_v22 = vpop.f32.mrf.mxu0 }
  0xbe   :  { %v1903_v26 = vadd.f32 %v127_v22, %v58_v63  ;;  %v1300_v39 = vpop.eup %1299  ;;  %v1911_v63 = vld [vmem:[%s2394_s4] ss:$0 sm:$0xff] }
  0xbf   :  { %v355_v62 = vmul.f32 %v1300_v39, %v353_v11  ;;  %vm360_vm1 = vweird.f32 %v1300_v39 }
  0xc0   :  { %2441 = vst [vmem:[#allocation26_spill] sm:$0xff] %v1903_v26  ;;  %vm361_vm3 = vmor %vm359_vm2, %vm360_vm1 }
  0xc1   :  { %v356_v0 = vsub.f32 1.0, %v355_v62  ;;  %v366_v62 = vor.u32 1.1754944e-38, %v365_v3 }
  0xc3   :  { %v357_v52 = vmul.f32 %v1300_v39, %v356_v0 }
  0xc5   :  { %v358_v4 = vadd.f32 %v1300_v39, %v357_v52  ;;  %v346_v26 = vpop.f32.mrf.mxu0 }
  0xc7   :  { %v362_v60 = vsel %vm361_vm3, %v1300_v39, %v358_v4 }
  0xc8   :  { %v367_v52 = vsel %vm364_vm4, %v366_v62, %v362_v60 }
  0xca   :  { %v326_v47 = vpop.f32.mrf.mxu3 }
  0xcb   :  { %v369_v53 = vadd.f32 %v326_v47, %v148_v59  ;;  %v188_v59 = vpop.f32.mrf.mxu2  ;;  %v1914_v47 = vperm.slane %v56_v61, 2 }
  0xcd   :  { %v1276_v1 = vmul.f32 -1.442695, %v369_v53  ;;  %v392_v53 = vadd.f32 %v1911_v63, %v346_v26  ;;  %v189_v0 = vadd.f32 %v188_v59, %v1914_v47  ;;  %v150_v59 = vpop.f32.mrf.mxu1 }
  0xcf   :  { %1301 = vpow2.f32 %v1276_v1  ;;  %v393_v11 = vmul.f32 %v392_v53, %v367_v52  ;;  %v2450_v52 = vld [vmem:[#allocation15_spill] sm:$0xff] }
  0xd1   :  { %v394_v44 = vadd.f32 %v393_v11, %v189_v0 }
  0xd5   :  { %v1302_v22 = vpop.eup %1301  ;;  %v1971_v11 = vpop.f32.mrf.mxu1 }
  0xd6   :  { %v373_v35 = vadd.f32 1.0, %v1302_v22  ;;  %2451 = vst [vmem:[#allocation28_spill] sm:$0xff] %v1971_v11  ;;  %v2460_v11 = vld [vmem:[#allocation27_spill] sm:$0xff] }
  0xd8   :  { %1303 = vrcp.f32 %v373_v35  ;;  %v385_v57 = vand.u32 2147483648, %v373_v35  ;;  %v383_v39 = vand.u32 2147483647, %v373_v35  ;;  %vm379_vm6 = vweird.f32 %v373_v35 }
  0xd9   :  { %1305 = vtanh.f32 %v394_v44  ;;  %v2444_v44 = vld [vmem:[#allocation13_spill] sm:$0xff] }
  0xda   :  { %v386_v26 = vor.u32 1.1754944e-38, %v385_v57  ;;  %vm384_vm8 = vcmp.eq.f32.partialorder %v383_v39, 8.507059e+37  ;;  %v2447_v57 = vld [vmem:[#allocation14_spill] sm:$0xff] }
  0xdd   :  { %v1973_v0 = vpop.f32.mrf.mxu1 }
  0xde   :  { %v1304_v1 = vpop.eup %1303  ;;  %2452 = vst [vmem:[#allocation29_spill] sm:$0xff] %v1973_v0 }
  0xdf   :  { %v375_v58 = vmul.f32 %v1304_v1, %v373_v35  ;;  %vm380_vm5 = vweird.f32 %v1304_v1  ;;  %v1306_v22 = vpop.eup %1305  ;;  %v2449_v35 = vld [vmem:[#allocation8_spill] sm:$0xff] }
  0xe0   :  { %vm381_vm7 = vmor %vm379_vm6, %vm380_vm5 }
  0xe1   :  { %v376_v51 = vsub.f32 1.0, %v375_v58  ;;  %v2448_v58 = vld [vmem:[#allocation11_spill] sm:$0xff] }
  0xe3   :  { %v377_v41 = vmul.f32 %v1304_v1, %v376_v51  ;;  %v2446_v51 = vld [vmem:[#allocation7_spill] sm:$0xff] }
  0xe5   :  { %v378_v9 = vadd.f32 %v1304_v1, %v377_v41  ;;  %v2443_v41 = vld [vmem:[#allocation6_spill] sm:$0xff] }
  0xe7   :  { %v382_v4 = vsel %vm381_vm7, %v1304_v1, %v378_v9  ;;  %v1975_v1 = vpop.f32.mrf.mxu1  ;;  %v191_v9 = vpop.f32.mrf.mxu2 }
  0xe8   :  { %v387_v61 = vsel %vm384_vm8, %v386_v26, %v382_v4  ;;  %2453 = vst [vmem:[#allocation30_spill] sm:$0xff] %v1975_v1 }
  0xe9   :  { %v396_v3 = vsub.f32 1.0, %v387_v61  ;;  %v398_v62 = vmul.f32 %v387_v61, %v1692_v50  ;;  %v2445_v50 = vld [vmem:[#allocation10_spill] sm:$0xff] }
  0xeb   :  { %v397_v60 = vmul.f32 %v1306_v22, %v396_v3 }
  0xed   :  { %v1918_v53 = vadd.f32 %v398_v62, %v397_v60  ;;  %v2459_v60 = vld [vmem:[#allocation17_spill] sm:$0xff] }
  0xef   :  { %419 = vmatmul.f32.vlgmr.msrb.gmra.mxu1 %v1918_v53  ;;  %439 = vmatmul.f32.vlgmr.msrb.gmra.mxu2 %v1918_v53  ;;  %v1977_v39 = vpop.f32.mrf.mxu1  ;;  %v1981_v4 = vpop.f32.mrf.mxu2 }
  0xf0   :  { %459 = vmatmul.f32.vlgmr.msrb.gmra.mxu3 %v1918_v53  ;;  %665 = vmatpush.msrb.mxu1 %v1535_v8  ;;  %2454 = vst [vmem:[#allocation31_spill] sm:$0xff] %v1977_v39 }
  0xf1   :  { %736 = vmatpush.msrb.mxu2 %v1511_v2  ;;  %756 = vmatpush.msrb.mxu3 %v1555_v13  ;;  %2456 = vst [vmem:[#allocation33_spill] sm:$0xff] %v1981_v4 }
  0xf2   :  { %666 = vmatpush.msrb.mxu1 %v1551_v12 }
  0xf3   :  { %737 = vmatpush.msrb.mxu2 %v1523_v5  ;;  %757 = vmatpush.msrb.mxu3 %v1567_v16 }
  0xf4   :  { %667 = vmatpush.msrb.mxu1 %v1557_v14 }
  0xf5   :  { %738 = vmatpush.msrb.mxu2 %v1528_v6  ;;  %758 = vmatpush.msrb.mxu3 %v1574_v19 }
  0xf6   :  { %668 = vmatpush.msrb.mxu1 %v1569_v17 }
  0xf7   :  { %739 = vmatpush.msrb.mxu2 %v1533_v7  ;;  %759 = vmatpush.msrb.mxu3 %v1592_v23  ;;  %v1979_v26 = vpop.f32.mrf.mxu1  ;;  %v1985_v3 = vpop.f32.mrf.mxu2 }
  0xf8   :  { %669 = vmatpush.msrb.mxu1 %v1578_v20  ;;  %2455 = vst [vmem:[#allocation32_spill] sm:$0xff] %v1979_v26 }
  0xf9   :  { %740 = vmatpush.msrb.mxu2 %v1544_v10  ;;  %760 = vmatpush.msrb.mxu3 %v1616_v29  ;;  %2458 = vst [vmem:[#allocation35_spill] sm:$0xff] %v1985_v3 }
  0xfa   :  { %670 = vmatpush.msrb.mxu1 %v1594_v24 }
  0xfb   :  { %741 = vmatpush.msrb.mxu2 %v1561_v15  ;;  %761 = vmatpush.msrb.mxu3 %v1625_v32 }
  0xfc   :  { %671 = vmatpush.msrb.mxu1 %v1606_v27 }
  0xfd   :  { %742 = vmatpush.msrb.mxu2 %v1571_v18  ;;  %762 = vmatpush.msrb.mxu3 %v1641_v36 }
  0xfe   :  { %672 = vmatpush.msrb.mxu1 %v1618_v30 }
  0xff   :  { %743 = vmatpush.msrb.mxu2 %v1582_v21  ;;  %763 = vmatpush.msrb.mxu3 %v1665_v42  ;;  %v1983_v61 = vpop.f32.mrf.mxu1 }
 0x100   :  { %673 = vmatpush.msrb.mxu1 %v1627_v33  ;;  %2457 = vst [vmem:[#allocation34_spill] sm:$0xff] %v1983_v61 }
 0x101   :  { %744 = vmatpush.msrb.mxu2 %v1596_v25  ;;  %764 = vmatpush.msrb.mxu3 %v1674_v45 }
 0x102   :  { %674 = vmatpush.msrb.mxu1 %v1643_v37 }
 0x103   :  { %745 = vmatpush.msrb.mxu2 %v1610_v28  ;;  %765 = vmatpush.msrb.mxu3 %v1685_v48 }
 0x104   :  { %675 = vmatpush.msrb.mxu1 %v1655_v40 }
 0x105   :  { %746 = vmatpush.msrb.mxu2 %v1620_v31  ;;  %766 = vmatpush.msrb.mxu3 %v1710_v54 }
 0x106   :  { %676 = vmatpush.msrb.mxu1 %v1667_v43 }
 0x107   :  { %747 = vmatpush.msrb.mxu2 %v1631_v34  ;;  %767 = vmatpush.msrb.mxu3 %v1715_v55 }
 0x108   :  { %677 = vmatpush.msrb.mxu1 %v1676_v46 }
 0x109   :  { %748 = vmatpush.msrb.mxu2 %v1645_v38  ;;  %768 = vmatpush.msrb.mxu3 %v1722_v56 }
 0x10a   :  { %678 = vmatpush.msrb.mxu1 %v1687_v49 }
 0x10b   :  { %749 = vmatpush.msrb.mxu2 %v2443_v41  ;;  %769 = vmatpush.msrb.mxu3 %v2444_v44 }
 0x10c   :  { %679 = vmatpush.msrb.mxu1 %v2445_v50 }
 0x10d   :  { %750 = vmatpush.msrb.mxu2 %v2446_v51  ;;  %770 = vmatpush.msrb.mxu3 %v2447_v57 }
 0x10e   :  { %680 = vmatpush.msrb.mxu1 %v2448_v58 }
 0x10f   :  { %751 = vmatpush.msrb.mxu2 %v2449_v35  ;;  %771 = vmatpush.msrb.mxu3 %v2450_v52  ;;  %v151_v35 = vadd.f32 %v150_v59, %v2460_v11 }
 0x16c   :  { %v420_v22 = vpop.f32.mrf.mxu1 }
 0x16d   :  { %v463_v62 = vadd.f32 %v420_v22, %v2459_v60 }
 0x16f   :  { %v1277_v52 = vmul.f32 -1.442695, %v463_v62 }
 0x171   :  { %1307 = vpow2.f32 %v1277_v52 }
 0x172   :  { %v440_v0 = vpop.f32.mrf.mxu2 }
 0x173   :  { %v483_v1 = vadd.f32 %v440_v0, %v151_v35  ;;  %v460_v59 = vpop.f32.mrf.mxu3 }
 0x175   :  { %v1278_v58 = vmul.f32 -1.442695, %v483_v1  ;;  %v503_v1 = vadd.f32 %v1911_v63, %v460_v59 }
 0x177   :  { %v1308_v39 = vpop.eup %1307  ;;  %1309 = vpow2.f32 %v1278_v58 }
 0x178   :  { %v467_v57 = vadd.f32 1.0, %v1308_v39  ;;  %v192_v39 = vadd.f32 %v191_v9, %v1914_v47 }
 0x17a   :  { %1311 = vrcp.f32 %v467_v57  ;;  %v479_v50 = vand.u32 2147483648, %v467_v57  ;;  %v477_v22 = vand.u32 2147483647, %v467_v57  ;;  %vm473_vm10 = vweird.f32 %v467_v57 }
 0x17c   :  { %v480_v35 = vor.u32 1.1754944e-38, %v479_v50  ;;  %vm478_vm12 = vcmp.eq.f32.partialorder %v477_v22, 8.507059e+37 }
 0x17d   :  { %v1310_v26 = vpop.eup %1309 }
 0x17e   :  { %v487_v4 = vadd.f32 1.0, %v1310_v26 }
 0x180   :  { %v1312_v51 = vpop.eup %1311  ;;  %1313 = vrcp.f32 %v487_v4  ;;  %v497_v41 = vand.u32 2147483647, %v487_v4  ;;  %vm493_vm14 = vweird.f32 %v487_v4 }
 0x181   :  { %v469_v61 = vmul.f32 %v1312_v51, %v467_v57  ;;  %vm474_vm9 = vweird.f32 %v1312_v51 }
 0x182   :  { %vm475_vm11 = vmor %vm473_vm10, %vm474_vm9  ;;  %vm498_vm0 = vcmp.eq.f32.partialorder %v497_v41, 8.507059e+37 }
 0x183   :  { %v470_v3 = vsub.f32 1.0, %v469_v61 }
 0x185   :  { %v471_v44 = vmul.f32 %v1312_v51, %v470_v3  ;;  %v499_v3 = vand.u32 2147483648, %v487_v4 }
 0x186   :  { %v1314_v60 = vpop.eup %1313 }
 0x187   :  { %v489_v52 = vmul.f32 %v1314_v60, %v487_v4  ;;  %v472_v62 = vadd.f32 %v1312_v51, %v471_v44  ;;  %vm494_vm13 = vweird.f32 %v1314_v60  ;;  %v500_v44 = vor.u32 1.1754944e-38, %v499_v3 }
 0x188   :  { %vm495_vm15 = vmor %vm493_vm14, %vm494_vm13 }
 0x189   :  { %v490_v58 = vsub.f32 1.0, %v489_v52  ;;  %v476_v0 = vsel %vm475_vm11, %v1312_v51, %v472_v62 }
 0x18a   :  { %v481_v26 = vsel %vm478_vm12, %v480_v35, %v476_v0 }
 0x18b   :  { %v491_v61 = vmul.f32 %v1314_v60, %v490_v58  ;;  %v504_v11 = vmul.f32 %v503_v1, %v481_v26  ;;  %v2474_v58 = vld [vmem:[#allocation33_spill] sm:$0xff] }
 0x18c   :  { %v195_v0 = vadd.f32 %v2474_v58, %v1914_v47  ;;  %v2476_v58 = vld [vmem:[#allocation21_spill] sm:$0xff] }
 0x18d   :  { %v492_v49 = vadd.f32 %v1314_v60, %v491_v61  ;;  %v505_v56 = vadd.f32 %v504_v11, %v192_v39 }
 0x18f   :  { %v496_v57 = vsel %vm495_vm15, %v1314_v60, %v492_v49  ;;  %1315 = vtanh.f32 %v505_v56 }
 0x190   :  { %v501_v50 = vsel %vm498_vm0, %v500_v44, %v496_v57 }
 0x191   :  { %v507_v51 = vsub.f32 1.0, %v501_v50  ;;  %v509_v9 = vmul.f32 %v501_v50, %v1918_v53 }
 0x195   :  { %v1316_v22 = vpop.eup %1315 }
 0x196   :  { %v508_v59 = vmul.f32 %v1316_v22, %v507_v51 }
 0x198   :  { %v1992_v52 = vadd.f32 %v509_v9, %v508_v59 }
 0x19a   :  { %530 = vmatmul.f32.vlgmr.msra.gmra.mxu0 %v1992_v52  ;;  %550 = vmatmul.f32.vlgmr.msra.gmra.mxu1 %v1992_v52 }
 0x19b   :  { %570 = vmatmul.f32.vlgmr.msra.gmra.mxu2 %v1992_v52  ;;  %776 = vmatpush.msra.mxu0 %v1535_v8  ;;  %v2465_v8 = vld [vmem:[#allocation10_spill] sm:$0xff] }
 0x19c   :  { %847 = vmatpush.msra.mxu1 %v1511_v2  ;;  %867 = vmatpush.msra.mxu2 %v1555_v13  ;;  %v2461_v2 = vld [vmem:[#allocation12_spill] sm:$0xff]  ;;  %v2468_v13 = vld [vmem:[#allocation11_spill] sm:$0xff] }
 0x19d   :  { %777 = vmatpush.msra.mxu0 %v1551_v12  ;;  %v2467_v12 = vld [vmem:[#allocation14_spill] sm:$0xff] }
 0x19e   :  { %848 = vmatpush.msra.mxu1 %v1523_v5  ;;  %868 = vmatpush.msra.mxu2 %v1567_v16  ;;  %v2462_v5 = vld [vmem:[#allocation9_spill] sm:$0xff]  ;;  %v2471_v16 = vld [vmem:[#allocation27_spill] sm:$0xff] }
 0x19f   :  { %778 = vmatpush.msra.mxu0 %v1557_v14  ;;  %v2469_v14 = vld [vmem:[#allocation8_spill] sm:$0xff] }
 0x1a0   :  { %849 = vmatpush.msra.mxu1 %v1528_v6  ;;  %869 = vmatpush.msra.mxu2 %v1574_v19  ;;  %v2463_v6 = vld [vmem:[#allocation6_spill] sm:$0xff] }
 0x1a1   :  { %779 = vmatpush.msra.mxu0 %v1569_v17  ;;  %v2472_v17 = vld [vmem:[#allocation28_spill] sm:$0xff] }
 0x1a2   :  { %850 = vmatpush.msra.mxu1 %v1533_v7  ;;  %870 = vmatpush.msra.mxu2 %v1592_v23  ;;  %v2464_v7 = vld [vmem:[#allocation13_spill] sm:$0xff] }
 0x1a3   :  { %780 = vmatpush.msra.mxu0 %v1578_v20 }
 0x1a4   :  { %851 = vmatpush.msra.mxu1 %v1544_v10  ;;  %871 = vmatpush.msra.mxu2 %v1616_v29  ;;  %v2466_v10 = vld [vmem:[#allocation7_spill] sm:$0xff] }
 0x1a5   :  { %781 = vmatpush.msra.mxu0 %v1594_v24 }
 0x1a6   :  { %852 = vmatpush.msra.mxu1 %v1561_v15  ;;  %872 = vmatpush.msra.mxu2 %v1625_v32  ;;  %v2470_v15 = vld [vmem:[#allocation15_spill] sm:$0xff] }
 0x1a7   :  { %782 = vmatpush.msra.mxu0 %v1606_v27 }
 0x1a8   :  { %853 = vmatpush.msra.mxu1 %v1571_v18  ;;  %873 = vmatpush.msra.mxu2 %v1641_v36  ;;  %v154_v18 = vadd.f32 %v2472_v17, %v2471_v16  ;;  %v2066_v17 = vld [vmem:[#allocation3 + $0x160] sm:$0xff] }
 0x1a9   :  { %783 = vmatpush.msra.mxu0 %v1618_v30 }
 0x1aa   :  { %854 = vmatpush.msra.mxu1 %v1582_v21  ;;  %874 = vmatpush.msra.mxu2 %v1665_v42  ;;  %v2473_v21 = vld [vmem:[#allocation19_spill] sm:$0xff] }
 0x1ab   :  { %784 = vmatpush.msra.mxu0 %v1627_v33 }
 0x1ac   :  { %855 = vmatpush.msra.mxu1 %v1596_v25  ;;  %875 = vmatpush.msra.mxu2 %v1674_v45 }
 0x1ad   :  { %785 = vmatpush.msra.mxu0 %v1643_v37 }
 0x1ae   :  { %856 = vmatpush.msra.mxu1 %v1610_v28  ;;  %876 = vmatpush.msra.mxu2 %v1685_v48 }
 0x1af   :  { %786 = vmatpush.msra.mxu0 %v1655_v40 }
 0x1b0   :  { %857 = vmatpush.msra.mxu1 %v1620_v31  ;;  %877 = vmatpush.msra.mxu2 %v1710_v54 }
 0x1b1   :  { %787 = vmatpush.msra.mxu0 %v1667_v43 }
 0x1b2   :  { %858 = vmatpush.msra.mxu1 %v1631_v34  ;;  %878 = vmatpush.msra.mxu2 %v1715_v55 }
 0x1b3   :  { %788 = vmatpush.msra.mxu0 %v1676_v46 }
 0x1b4   :  { %859 = vmatpush.msra.mxu1 %v1645_v38  ;;  %879 = vmatpush.msra.mxu2 %v2461_v2 }
 0x1b5   :  { %789 = vmatpush.msra.mxu0 %v2462_v5 }
 0x1b6   :  { %860 = vmatpush.msra.mxu1 %v2463_v6  ;;  %880 = vmatpush.msra.mxu2 %v2464_v7  ;;  %v2057_v6 = vld [vmem:[#allocation3 + $0x178] sm:$0xff] }
 0x1b7   :  { %790 = vmatpush.msra.mxu0 %v2465_v8 }
 0x1b8   :  { %861 = vmatpush.msra.mxu1 %v2466_v10  ;;  %881 = vmatpush.msra.mxu2 %v2467_v12  ;;  %v2060_v10 = vld [vmem:[#allocation3 + $0x168] sm:$0xff] }
 0x1b9   :  { %791 = vmatpush.msra.mxu0 %v2468_v13 }
 0x1ba   :  { %862 = vmatpush.msra.mxu1 %v2469_v14  ;;  %882 = vmatpush.msra.mxu2 %v2470_v15  ;;  %v2063_v14 = vld [vmem:[#allocation3 + $0x170] sm:$0xff] }
 0x217   :  { %v531_v19 = vpop.f32.mrf.mxu0  ;;  %v551_v20 = vpop.f32.mrf.mxu1 }
 0x218   :  { %v574_v23 = vadd.f32 %v531_v19, %v2473_v21  ;;  %v594_v24 = vadd.f32 %v551_v20, %v154_v18  ;;  %v2069_v18 = vld [vmem:[#allocation3 + $0x150] sm:$0xff]  ;;  %v2072_v19 = vld [vmem:[#allocation3 + $0x158] sm:$0xff]  ;;  %v2075_v20 = vld [vmem:[#allocation3 + $0x148] sm:$0xff] }
 0x219   :  { %v2078_v21 = vld [vmem:[#allocation3 + $0x138] sm:$0xff] }
 0x21a   :  { %v1279_v25 = vmul.f32 -1.442695, %v574_v23  ;;  %v1280_v27 = vmul.f32 -1.442695, %v594_v24  ;;  %v2081_v23 = vld [vmem:[#allocation3 + $0x140] sm:$0xff]  ;;  %v2084_v24 = vld [vmem:[#allocation3 + $0x130] sm:$0xff] }
 0x21c   :  { %1317 = vpow2.f32 %v1279_v25  ;;  %v2087_v25 = vld [vmem:[#allocation3 + $0x120] sm:$0xff] }
 0x21d   :  { %1319 = vpow2.f32 %v1280_v27  ;;  %v2090_v27 = vld [vmem:[#allocation3 + $0x128] sm:$0xff] }
 0x21e   :  { %v571_v56 = vpop.f32.mrf.mxu2 }
 0x21f   :  { %v614_v60 = vadd.f32 %v1911_v63, %v571_v56  ;;  %v2137_v56 = vld [vmem:[#allocation3 + $0x90] sm:$0xff] }
 0x222   :  { %v1318_v28 = vpop.eup %1317 }
 0x223   :  { %v1320_v29 = vpop.eup %1319  ;;  %v578_v30 = vadd.f32 1.0, %v1318_v28  ;;  %v2093_v28 = vld [vmem:[#allocation3 + $0x118] sm:$0xff] }
 0x224   :  { %v598_v31 = vadd.f32 1.0, %v1320_v29  ;;  %v2096_v29 = vld [vmem:[#allocation3 + $0x108] sm:$0xff] }
 0x225   :  { %1321 = vrcp.f32 %v578_v30  ;;  %v590_v40 = vand.u32 2147483648, %v578_v30  ;;  %v588_v46 = vand.u32 2147483647, %v578_v30  ;;  %vm584_vm2 = vweird.f32 %v578_v30 }
 0x226   :  { %1323 = vrcp.f32 %v598_v31  ;;  %v610_v1 = vand.u32 2147483648, %v598_v31  ;;  %vm604_vm6 = vweird.f32 %v598_v31  ;;  %v608_v26 = vand.u32 2147483647, %v598_v31 }
 0x227   :  { %v591_v11 = vor.u32 1.1754944e-38, %v590_v40  ;;  %vm589_vm4 = vcmp.eq.f32.partialorder %v588_v46, 8.507059e+37  ;;  %v2123_v40 = vld [vmem:[#allocation3 + $0xc0] sm:$0xff]  ;;  %v2130_v46 = vld [vmem:[#allocation3 + $0xa8] sm:$0xff] }
 0x228   :  { %v611_v44 = vor.u32 1.1754944e-38, %v610_v1  ;;  %vm609_vm8 = vcmp.eq.f32.partialorder %v608_v26, 8.507059e+37 }
 0x22b   :  { %v1322_v32 = vpop.eup %1321 }
 0x22c   :  { %v1324_v33 = vpop.eup %1323  ;;  %v580_v34 = vmul.f32 %v1322_v32, %v578_v30  ;;  %vm585_vm1 = vweird.f32 %v1322_v32  ;;  %v2099_v30 = vld [vmem:[#allocation3 + $0x110] sm:$0xff] }
 0x22d   :  { %v600_v36 = vmul.f32 %v1324_v33, %v598_v31  ;;  %vm586_vm3 = vmor %vm584_vm2, %vm585_vm1  ;;  %vm605_vm5 = vweird.f32 %v1324_v33  ;;  %v2102_v31 = vld [vmem:[#allocation3 + $0x100] sm:$0xff] }
 0x22e   :  { %v581_v37 = vsub.f32 1.0, %v580_v34  ;;  %vm606_vm7 = vmor %vm604_vm6, %vm605_vm5  ;;  %v2111_v34 = vld [vmem:[#allocation3 + $0xe8] sm:$0xff] }
 0x22f   :  { %v601_v38 = vsub.f32 1.0, %v600_v36  ;;  %v2114_v36 = vld [vmem:[#allocation3 + $0xd8] sm:$0xff] }
 0x230   :  { %v582_v43 = vmul.f32 %v1322_v32, %v581_v37  ;;  %v2117_v37 = vld [vmem:[#allocation3 + $0xe0] sm:$0xff] }
 0x231   :  { %v602_v49 = vmul.f32 %v1324_v33, %v601_v38  ;;  %v2120_v38 = vld [vmem:[#allocation3 + $0xd0] sm:$0xff] }
 0x232   :  { %v583_v41 = vadd.f32 %v1322_v32, %v582_v43  ;;  %v2127_v43 = vld [vmem:[#allocation3 + $0xb8] sm:$0xff] }
 0x233   :  { %v603_v62 = vadd.f32 %v1324_v33, %v602_v49  ;;  %v2134_v49 = vld [vmem:[#allocation3 + $0xa0] sm:$0xff] }
 0x234   :  { %v587_v4 = vsel %vm586_vm3, %v1322_v32, %v583_v41  ;;  %v2105_v32 = vld [vmem:[#allocation3 + $0xf0] sm:$0xff]  ;;  %v2144_v41 = vld [vmem:[#allocation3 + $0x78] sm:$0xff] }
 0x235   :  { %v592_v35 = vsel %vm589_vm4, %v591_v11, %v587_v4  ;;  %v607_v3 = vsel %vm606_vm7, %v1324_v33, %v603_v62  ;;  %v2108_v33 = vld [vmem:[#allocation3 + $0xf8] sm:$0xff]  ;;  %v2151_v11 = vld [vmem:[#allocation3 + $0x60] sm:$0xff]  ;;  %v2158_v4 = vld [vmem:[#allocation3 + $0x48] sm:$0xff] }
 0x236   :  { %v615_v39 = vmul.f32 %v614_v60, %v592_v35  ;;  %v612_v57 = vsel %vm609_vm8, %v611_v44, %v607_v3  ;;  %v2173_v60 = vld [vmem:[#allocation3] sm:$0xff] }
 0x237   :  { %v618_v50 = vsub.f32 1.0, %v612_v57  ;;  %v620_v59 = vmul.f32 %v612_v57, %v1992_v52 }
 0x238   :  { %v616_v61 = vadd.f32 %v615_v39, %v195_v0 }
 0x23a   :  { %1325 = vtanh.f32 %v616_v61 }
 0x240   :  { %v1326_v51 = vpop.eup %1325 }
 0x241   :  { %v619_v22 = vmul.f32 %v1326_v51, %v618_v50 }
 0x243   :  { %v2052_v9 = vadd.f32 %v620_v59, %v619_v22 }
 0x245   :  { %641 = vmatmul.f32.vlgmr.msra.gmra.mxu3 %v2052_v9  ;;  %661 = vmatmul.f32.vlgmr.msrb.gmra.mxu0 %v2052_v9 }
 0x246   :  { %681 = vmatmul.f32.vlgmr.msrb.gmra.mxu1 %v2052_v9  ;;  %887 = vmatpush.msra.mxu3 %v2057_v6 }
 0x247   :  { %958 = vmatpush.msrb.mxu0 %v2060_v10  ;;  %978 = vmatpush.msrb.mxu1 %v2063_v14 }
 0x248   :  { %888 = vmatpush.msra.mxu3 %v2066_v17 }
 0x249   :  { %959 = vmatpush.msrb.mxu0 %v2069_v18  ;;  %979 = vmatpush.msrb.mxu1 %v2072_v19 }
 0x24a   :  { %889 = vmatpush.msra.mxu3 %v2075_v20 }
 0x24b   :  { %960 = vmatpush.msrb.mxu0 %v2078_v21  ;;  %980 = vmatpush.msrb.mxu1 %v2081_v23 }
 0x24c   :  { %890 = vmatpush.msra.mxu3 %v2084_v24 }
 0x24d   :  { %961 = vmatpush.msrb.mxu0 %v2087_v25  ;;  %981 = vmatpush.msrb.mxu1 %v2090_v27 }
 0x24e   :  { %891 = vmatpush.msra.mxu3 %v2093_v28 }
 0x24f   :  { %962 = vmatpush.msrb.mxu0 %v2096_v29  ;;  %982 = vmatpush.msrb.mxu1 %v2099_v30 }
 0x250   :  { %892 = vmatpush.msra.mxu3 %v2102_v31 }
 0x251   :  { %963 = vmatpush.msrb.mxu0 %v2105_v32  ;;  %983 = vmatpush.msrb.mxu1 %v2108_v33 }
 0x252   :  { %893 = vmatpush.msra.mxu3 %v2111_v34 }
 0x253   :  { %964 = vmatpush.msrb.mxu0 %v2114_v36  ;;  %984 = vmatpush.msrb.mxu1 %v2117_v37 }
 0x254   :  { %894 = vmatpush.msra.mxu3 %v2120_v38 }
 0x255   :  { %965 = vmatpush.msrb.mxu0 %v2123_v40  ;;  %985 = vmatpush.msrb.mxu1 %v1665_v42  ;;  %v2141_v42 = vld [vmem:[#allocation3 + $0x88] sm:$0xff] }
 0x256   :  { %895 = vmatpush.msra.mxu3 %v2127_v43 }
 0x257   :  { %966 = vmatpush.msrb.mxu0 %v2130_v46  ;;  %986 = vmatpush.msrb.mxu1 %v1674_v45  ;;  %v2148_v45 = vld [vmem:[#allocation3 + $0x70] sm:$0xff] }
 0x258   :  { %896 = vmatpush.msra.mxu3 %v2134_v49 }
 0x259   :  { %967 = vmatpush.msrb.mxu0 %v2137_v56  ;;  %987 = vmatpush.msrb.mxu1 %v1685_v48  ;;  %v2155_v48 = vld [vmem:[#allocation3 + $0x58] sm:$0xff] }
 0x25a   :  { %897 = vmatpush.msra.mxu3 %v2141_v42 }
 0x25b   :  { %968 = vmatpush.msrb.mxu0 %v2144_v41  ;;  %988 = vmatpush.msrb.mxu1 %v1710_v54  ;;  %v2163_v54 = vld [vmem:[#allocation3 + $0x30] sm:$0xff] }
 0x25c   :  { %898 = vmatpush.msra.mxu3 %v2148_v45 }
 0x25d   :  { %969 = vmatpush.msrb.mxu0 %v2151_v11  ;;  %989 = vmatpush.msrb.mxu1 %v1715_v55  ;;  %v2168_v55 = vld [vmem:[#allocation3 + $0x18] sm:$0xff] }
 0x25e   :  { %899 = vmatpush.msra.mxu3 %v2155_v48 }
 0x25f   :  { %970 = vmatpush.msrb.mxu0 %v2158_v4  ;;  %990 = vmatpush.msrb.mxu1 %v2461_v2  ;;  %v2475_v2 = vld [vmem:[#allocation29_spill] sm:$0xff] }
 0x260   :  { %900 = vmatpush.msra.mxu3 %v2462_v5  ;;  %v157_v5 = vadd.f32 %v2475_v2, %v2471_v16 }
 0x261   :  { %971 = vmatpush.msrb.mxu0 %v2163_v54  ;;  %991 = vmatpush.msrb.mxu1 %v2464_v7 }
 0x262   :  { %901 = vmatpush.msra.mxu3 %v2465_v8 }
 0x263   :  { %972 = vmatpush.msrb.mxu0 %v2168_v55  ;;  %992 = vmatpush.msrb.mxu1 %v2467_v12 }
 0x264   :  { %902 = vmatpush.msra.mxu3 %v2468_v13 }
 0x265   :  { %973 = vmatpush.msrb.mxu0 %v2173_v60  ;;  %993 = vmatpush.msrb.mxu1 %v2470_v15 }
 0x2c2   :  { %v662_v7 = vpop.f32.mrf.mxu0 }
 0x2c3   :  { %v705_v62 = vadd.f32 %v662_v7, %v157_v5  ;;  %v682_v5 = vpop.f32.mrf.mxu1 }
 0x2c5   :  { %v1282_v8 = vmul.f32 -1.442695, %v705_v62 }
 0x2c7   :  { %1327 = vpow2.f32 %v1282_v8  ;;  %v725_v8 = vadd.f32 %v1911_v63, %v682_v5 }
 0x2c8   :  { %v642_v35 = vpop.f32.mrf.mxu3 }
 0x2c9   :  { %v685_v0 = vadd.f32 %v642_v35, %v2476_v58 }
 0x2cb   :  { %v1281_v1 = vmul.f32 -1.442695, %v685_v0 }
 0x2cd   :  { %v1328_v12 = vpop.eup %1327  ;;  %1329 = vpow2.f32 %v1281_v1  ;;  %v2477_v1 = vld [vmem:[#allocation35_spill] sm:$0xff] }
 0x2ce   :  { %v709_v13 = vadd.f32 1.0, %v1328_v12  ;;  %v198_v12 = vadd.f32 %v2477_v1, %v1914_v47 }
 0x2d0   :  { %1331 = vrcp.f32 %v709_v13  ;;  %vm715_vm14 = vweird.f32 %v709_v13 }
 0x2d3   :  { %v1330_v39 = vpop.eup %1329 }
 0x2d4   :  { %v689_v26 = vadd.f32 1.0, %v1330_v39  ;;  %v721_v39 = vand.u32 2147483648, %v709_v13 }
 0x2d6   :  { %1333 = vrcp.f32 %v689_v26  ;;  %v1332_v61 = vpop.eup %1331  ;;  %v701_v51 = vand.u32 2147483648, %v689_v26  ;;  %v699_v59 = vand.u32 2147483647, %v689_v26  ;;  %vm695_vm10 = vweird.f32 %v689_v26 }
 0x2d7   :  { %v711_v15 = vmul.f32 %v1332_v61, %v709_v13  ;;  %vm716_vm13 = vweird.f32 %v1332_v61 }
 0x2d8   :  { %v702_v62 = vor.u32 1.1754944e-38, %v701_v51  ;;  %vm700_vm12 = vcmp.eq.f32.partialorder %v699_v59, 8.507059e+37  ;;  %vm717_vm15 = vmor %vm715_vm14, %vm716_vm13 }
 0x2d9   :  { %v712_v57 = vsub.f32 1.0, %v711_v15 }
 0x2db   :  { %v713_v2 = vmul.f32 %v1332_v61, %v712_v57 }
 0x2dc   :  { %v1334_v3 = vpop.eup %1333 }
 0x2dd   :  { %v691_v44 = vmul.f32 %v1334_v3, %v689_v26  ;;  %vm696_vm9 = vweird.f32 %v1334_v3  ;;  %v714_v58 = vadd.f32 %v1332_v61, %v713_v2  ;;  %v722_v26 = vor.u32 1.1754944e-38, %v721_v39 }
 0x2de   :  { %vm697_vm11 = vmor %vm695_vm10, %vm696_vm9 }
 0x2df   :  { %v692_v50 = vsub.f32 1.0, %v691_v44  ;;  %v719_v44 = vand.u32 2147483647, %v709_v13 }
 0x2e1   :  { %v693_v22 = vmul.f32 %v1334_v3, %v692_v50  ;;  %v718_v50 = vsel %vm717_vm15, %v1332_v61, %v714_v58  ;;  %vm720_vm0 = vcmp.eq.f32.partialorder %v719_v44, 8.507059e+37 }
 0x2e2   :  { %v723_v51 = vsel %vm720_vm0, %v722_v26, %v718_v50 }
 0x2e3   :  { %v694_v7 = vadd.f32 %v1334_v3, %v693_v22  ;;  %v729_v22 = vsub.f32 1.0, %v723_v51  ;;  %v731_v2 = vmul.f32 %v723_v51, %v2052_v9 }
 0x2e5   :  { %v698_v35 = vsel %vm697_vm11, %v1334_v3, %v694_v7 }
 0x2e6   :  { %v703_v0 = vsel %vm700_vm12, %v702_v62, %v698_v35 }
 0x2e7   :  { %v726_v15 = vmul.f32 %v725_v8, %v703_v0 }
 0x2e9   :  { %v727_v57 = vadd.f32 %v726_v15, %v198_v12 }
 0x2eb   :  { %1335 = vtanh.f32 %v727_v57 }
 0x2f1   :  { %v1336_v3 = vpop.eup %1335 }
 0x2f2   :  { %v730_v59 = vmul.f32 %v1336_v3, %v729_v22 }
 0x2f4   :  { %v2184_v5 = vadd.f32 %v731_v2, %v730_v59  ;;  %v2480_v59 = vld [vmem:[#allocation16_spill] sm:$0xff] }
 0x2f5   :  { %v201_v2 = vadd.f32 %v2480_v59, %v1914_v47  ;;  %v2483_v59 = vld [vmem:[#allocation18_spill] sm:$0xff] }
 0x2f6   :  { %752 = vmatmul.f32.vlgmr.msrb.gmra.mxu2 %v2184_v5  ;;  %772 = vmatmul.f32.vlgmr.msrb.gmra.mxu3 %v2184_v5 }
 0x2f7   :  { %792 = vmatmul.f32.vlgmr.msra.gmra.mxu0 %v2184_v5  ;;  %998 = vmatpush.msrb.mxu2 %v2057_v6 }
 0x2f8   :  { %1069 = vmatpush.msrb.mxu3 %v2060_v10  ;;  %1089 = vmatpush.msra.mxu0 %v2063_v14  ;;  %v1413_v10 = vld [vmem:[#allocation3 + $0xc8] sm:$0xff]  ;;  %v1414_v14 = vld [vmem:[#allocation3 + $0xb0] sm:$0xff] }
 0x2f9   :  { %999 = vmatpush.msrb.mxu2 %v2066_v17 }
 0x2fa   :  { %1070 = vmatpush.msrb.mxu3 %v2069_v18  ;;  %1090 = vmatpush.msra.mxu0 %v2072_v19  ;;  %v1415_v18 = vld [vmem:[#allocation3 + $0x98] sm:$0xff]  ;;  %v1416_v19 = vld [vmem:[#allocation3 + $0x80] sm:$0xff] }
 0x2fb   :  { %1000 = vmatpush.msrb.mxu2 %v2075_v20 }
 0x2fc   :  { %1071 = vmatpush.msrb.mxu3 %v2078_v21  ;;  %1091 = vmatpush.msra.mxu0 %v2081_v23  ;;  %v1417_v21 = vld [vmem:[#allocation3 + $0x68] sm:$0xff]  ;;  %v1418_v23 = vld [vmem:[#allocation3 + $0x50] sm:$0xff] }
 0x2fd   :  { %1001 = vmatpush.msrb.mxu2 %v2084_v24 }
 0x2fe   :  { %1072 = vmatpush.msrb.mxu3 %v2087_v25  ;;  %1092 = vmatpush.msra.mxu0 %v2090_v27  ;;  %v2222_v25 = vld [vmem:[#allocation3 + $0x40] sm:$0xff]  ;;  %v1420_v27 = vld [vmem:[#allocation3 + $0x38] sm:$0xff] }
 0x2ff   :  { %1002 = vmatpush.msrb.mxu2 %v2093_v28 }
 0x300   :  { %1073 = vmatpush.msrb.mxu3 %v2096_v29  ;;  %1093 = vmatpush.msra.mxu0 %v2099_v30  ;;  %v2226_v29 = vld [vmem:[#allocation3 + $0x28] sm:$0xff]  ;;  %v1422_v30 = vld [vmem:[#allocation3 + $0x20] sm:$0xff] }
 0x301   :  { %1003 = vmatpush.msrb.mxu2 %v2102_v31 }
 0x302   :  { %1074 = vmatpush.msrb.mxu3 %v2105_v32  ;;  %1094 = vmatpush.msra.mxu0 %v2108_v33  ;;  %v2230_v32 = vld [vmem:[#allocation3 + $0x10] sm:$0xff]  ;;  %v1424_v33 = vld [vmem:[#allocation3 + $0x8] sm:$0xff] }
 0x303   :  { %1004 = vmatpush.msrb.mxu2 %v2111_v34 }
 0x304   :  { %1075 = vmatpush.msrb.mxu3 %v2114_v36  ;;  %1095 = vmatpush.msra.mxu0 %v2117_v37  ;;  %v2478_v36 = vld [vmem:[#allocation30_spill] sm:$0xff] }
 0x305   :  { %1005 = vmatpush.msrb.mxu2 %v2120_v38  ;;  %v160_v37 = vadd.f32 %v2478_v36, %v2471_v16 }
 0x306   :  { %1076 = vmatpush.msrb.mxu3 %v2123_v40  ;;  %1096 = vmatpush.msra.mxu0 %v1413_v10 }
 0x307   :  { %1006 = vmatpush.msrb.mxu2 %v2127_v43 }
 0x308   :  { %1077 = vmatpush.msrb.mxu3 %v2130_v46  ;;  %1097 = vmatpush.msra.mxu0 %v1414_v14 }
 0x309   :  { %1007 = vmatpush.msrb.mxu2 %v2134_v49 }
 0x30a   :  { %1078 = vmatpush.msrb.mxu3 %v2137_v56  ;;  %1098 = vmatpush.msra.mxu0 %v1415_v18  ;;  %v2479_v56 = vld [vmem:[#allocation23_spill] sm:$0xff] }
 0x30b   :  { %1008 = vmatpush.msrb.mxu2 %v2141_v42 }
 0x30c   :  { %1079 = vmatpush.msrb.mxu3 %v2144_v41  ;;  %1099 = vmatpush.msra.mxu0 %v1416_v19 }
 0x30d   :  { %1009 = vmatpush.msrb.mxu2 %v2148_v45 }
 0x30e   :  { %1080 = vmatpush.msrb.mxu3 %v2151_v11  ;;  %1100 = vmatpush.msra.mxu0 %v1417_v21 }
 0x30f   :  { %1010 = vmatpush.msrb.mxu2 %v2155_v48 }
 0x310   :  { %1081 = vmatpush.msrb.mxu3 %v2158_v4  ;;  %1101 = vmatpush.msra.mxu0 %v1418_v23 }
 0x311   :  { %1011 = vmatpush.msrb.mxu2 %v2222_v25 }
 0x312   :  { %1082 = vmatpush.msrb.mxu3 %v2163_v54  ;;  %1102 = vmatpush.msra.mxu0 %v1420_v27 }
 0x313   :  { %1012 = vmatpush.msrb.mxu2 %v2226_v29 }
 0x314   :  { %1083 = vmatpush.msrb.mxu3 %v2168_v55  ;;  %1103 = vmatpush.msra.mxu0 %v1422_v30 }
 0x315   :  { %1013 = vmatpush.msrb.mxu2 %v2230_v32 }
 0x316   :  { %1084 = vmatpush.msrb.mxu3 %v2173_v60  ;;  %1104 = vmatpush.msra.mxu0 %v1424_v33 }
 0x374   :  { %v793_v15 = vpop.f32.mrf.mxu0 }
 0x375   :  { %v836_v26 = vadd.f32 %v1911_v63, %v793_v15 }
 0x379   :  { %v753_v40 = vpop.f32.mrf.mxu2  ;;  %v773_v46 = vpop.f32.mrf.mxu3 }
 0x37a   :  { %v796_v41 = vadd.f32 %v753_v40, %v2479_v56  ;;  %v816_v11 = vadd.f32 %v773_v46, %v160_v37  ;;  %v1184_v40 = vld [vmem:[%s2395_s5 + $0x38] sm:$0xff]  ;;  %v1183_v56 = vld [vmem:[%s2395_s5 + $0x30] sm:$0xff] }
 0x37c   :  { %v1283_v4 = vmul.f32 -1.442695, %v796_v41  ;;  %v1284_v54 = vmul.f32 -1.442695, %v816_v11  ;;  %v1182_v41 = vld [vmem:[%s2395_s5 + $0x28] sm:$0xff] }
 0x37e   :  { %1337 = vpow2.f32 %v1283_v4  ;;  %v1181_v4 = vld [vmem:[%s2395_s5 + $0x20] sm:$0xff] }
 0x37f   :  { %1339 = vpow2.f32 %v1284_v54 }
 0x384   :  { %v1338_v55 = vpop.eup %1337 }
 0x385   :  { %v1340_v13 = vpop.eup %1339  ;;  %v800_v61 = vadd.f32 1.0, %v1338_v55  ;;  %v1180_v55 = vld [vmem:[%s2395_s5 + $0x18] sm:$0xff] }
 0x386   :  { %v820_v7 = vadd.f32 1.0, %v1340_v13  ;;  %v1179_v13 = vld [vmem:[%s2395_s5 + $0x10] sm:$0xff] }
 0x387   :  { %1341 = vrcp.f32 %v800_v61  ;;  %v812_v0 = vand.u32 2147483648, %v800_v61  ;;  %v810_v39 = vand.u32 2147483647, %v800_v61  ;;  %vm806_vm2 = vweird.f32 %v800_v61 }
 0x388   :  { %1343 = vrcp.f32 %v820_v7  ;;  %v832_v14 = vand.u32 2147483648, %v820_v7  ;;  %vm826_vm6 = vweird.f32 %v820_v7  ;;  %v830_v18 = vand.u32 2147483647, %v820_v7 }
 0x389   :  { %v813_v50 = vor.u32 1.1754944e-38, %v812_v0  ;;  %vm811_vm4 = vcmp.eq.f32.partialorder %v810_v39, 8.507059e+37 }
 0x38a   :  { %v833_v23 = vor.u32 1.1754944e-38, %v832_v14  ;;  %vm831_vm8 = vcmp.eq.f32.partialorder %v830_v18, 8.507059e+37 }
 0x38d   :  { %v1342_v60 = vpop.eup %1341 }
 0x38e   :  { %v1344_v62 = vpop.eup %1343  ;;  %v802_v8 = vmul.f32 %v1342_v60, %v800_v61  ;;  %vm807_vm1 = vweird.f32 %v1342_v60 }
 0x38f   :  { %v822_v35 = vmul.f32 %v1344_v62, %v820_v7  ;;  %vm808_vm3 = vmor %vm806_vm2, %vm807_vm1  ;;  %vm827_vm5 = vweird.f32 %v1344_v62  ;;  %v1178_v7 = vld [vmem:[%s2395_s5 + $0x8] sm:$0xff] }
 0x390   :  { %v803_v58 = vsub.f32 1.0, %v802_v8  ;;  %vm828_vm7 = vmor %vm826_vm6, %vm827_vm5 }
 0x391   :  { %v823_v1 = vsub.f32 1.0, %v822_v35 }
 0x392   :  { %v804_v12 = vmul.f32 %v1342_v60, %v803_v58 }
 0x393   :  { %v824_v44 = vmul.f32 %v1344_v62, %v823_v1 }
 0x394   :  { %v805_v57 = vadd.f32 %v1342_v60, %v804_v12 }
 0x395   :  { %v825_v3 = vadd.f32 %v1344_v62, %v824_v44 }
 0x396   :  { %v809_v51 = vsel %vm808_vm3, %v1342_v60, %v805_v57 }
 0x397   :  { %v814_v22 = vsel %vm811_vm4, %v813_v50, %v809_v51  ;;  %v829_v21 = vsel %vm828_vm7, %v1344_v62, %v825_v3  ;;  %v1177_v62 = vld [vmem:[%s2395_s5] sm:$0xff] }
 0x398   :  { %v837_v10 = vmul.f32 %v836_v26, %v814_v22  ;;  %v834_v27 = vsel %vm831_vm8, %v833_v23, %v829_v21  ;;  %v2316_v22 = vld [vmem:[%s2394_s4] ss:$0 sm:$0xff] }
 0x399   :  { %v840_v63 = vsub.f32 1.0, %v834_v27  ;;  %v842_v36 = vmul.f32 %v834_v27, %v2184_v5 }
 0x39a   :  { %v838_v19 = vadd.f32 %v837_v10, %v201_v2  ;;  %v204_v2 = vadd.f32 %v2483_v59, %v1914_v47 }
 0x39c   :  { %1345 = vtanh.f32 %v838_v19 }
 0x3a2   :  { %v1346_v30 = vpop.eup %1345 }
 0x3a3   :  { %v841_v33 = vmul.f32 %v1346_v30, %v840_v63 }
 0x3a5   :  { %v2241_v37 = vadd.f32 %v842_v36, %v841_v33 }
 0x3a7   :  { %863 = vmatmul.f32.vlgmr.msra.gmra.mxu1 %v2241_v37  ;;  %883 = vmatmul.f32.vlgmr.msra.gmra.mxu2 %v2241_v37 }
 0x3a8   :  { %903 = vmatmul.f32.vlgmr.msra.gmra.mxu3 %v2241_v37  ;;  %1109 = vmatpush.msra.mxu1 %v2057_v6  ;;  %v1192_v6 = vld [vmem:[%s2395_s5 + $0x78] sm:$0xff] }
 0x3a9   :  { %1197 = vmatpush.msra.mxu2 %v1192_v6 }
 0x3aa   :  { %1110 = vmatpush.msra.mxu1 %v2066_v17  ;;  %v1191_v17 = vld [vmem:[%s2395_s5 + $0x70] sm:$0xff] }
 0x3ab   :  { %1198 = vmatpush.msra.mxu2 %v1191_v17 }
 0x3ac   :  { %1111 = vmatpush.msra.mxu1 %v2075_v20  ;;  %v1190_v20 = vld [vmem:[%s2395_s5 + $0x68] sm:$0xff] }
 0x3ad   :  { %1199 = vmatpush.msra.mxu2 %v1190_v20 }
 0x3ae   :  { %1112 = vmatpush.msra.mxu1 %v2084_v24  ;;  %v1189_v24 = vld [vmem:[%s2395_s5 + $0x60] sm:$0xff] }
 0x3af   :  { %1200 = vmatpush.msra.mxu2 %v1189_v24 }
 0x3b0   :  { %1113 = vmatpush.msra.mxu1 %v2093_v28  ;;  %v1188_v28 = vld [vmem:[%s2395_s5 + $0x58] sm:$0xff] }
 0x3b1   :  { %1201 = vmatpush.msra.mxu2 %v1188_v28  ;;  %v2484_v28 = vld [vmem:[#allocation32_spill] sm:$0xff] }
 0x3b2   :  { %1114 = vmatpush.msra.mxu1 %v2102_v31 }
 0x3b4   :  { %1115 = vmatpush.msra.mxu1 %v2111_v34  ;;  %v2481_v34 = vld [vmem:[#allocation24_spill] sm:$0xff] }
 0x3b6   :  { %1116 = vmatpush.msra.mxu1 %v2120_v38 }
 0x3b8   :  { %1117 = vmatpush.msra.mxu1 %v2127_v43  ;;  %v1187_v43 = vld [vmem:[%s2395_s5 + $0x50] sm:$0xff] }
 0x3b9   :  { %1202 = vmatpush.msra.mxu2 %v1187_v43  ;;  %v2485_v43 = vld [vmem:[#allocation25_spill] sm:$0xff] }
 0x3ba   :  { %1118 = vmatpush.msra.mxu1 %v2134_v49 }
 0x3bc   :  { %1119 = vmatpush.msra.mxu1 %v2141_v42  ;;  %v1186_v42 = vld [vmem:[%s2395_s5 + $0x48] sm:$0xff] }
 0x3bd   :  { %1203 = vmatpush.msra.mxu2 %v1186_v42 }
 0x3be   :  { %1120 = vmatpush.msra.mxu1 %v2148_v45  ;;  %v2482_v45 = vld [vmem:[#allocation31_spill] sm:$0xff] }
 0x3c0   :  { %1121 = vmatpush.msra.mxu1 %v2155_v48  ;;  %v163_v48 = vadd.f32 %v2482_v45, %v2471_v16 }
 0x3c2   :  { %1122 = vmatpush.msra.mxu1 %v2222_v25  ;;  %v1185_v25 = vld [vmem:[%s2395_s5 + $0x40] sm:$0xff] }
 0x3c3   :  { %1204 = vmatpush.msra.mxu2 %v1185_v25 }
 0x3c4   :  { %1123 = vmatpush.msra.mxu1 %v2226_v29 }
 0x3c5   :  { %1205 = vmatpush.msra.mxu2 %v1184_v40 }
 0x3c6   :  { %1124 = vmatpush.msra.mxu1 %v2230_v32 }
 0x3c7   :  { %1206 = vmatpush.msra.mxu2 %v1183_v56 }
 0x3c9   :  { %1207 = vmatpush.msra.mxu2 %v1182_v41 }
 0x3cb   :  { %1208 = vmatpush.msra.mxu2 %v1181_v4 }
 0x3cd   :  { %1209 = vmatpush.msra.mxu2 %v1180_v55 }
 0x3cf   :  { %1210 = vmatpush.msra.mxu2 %v1179_v13 }
 0x3d1   :  { %1211 = vmatpush.msra.mxu2 %v1178_v7 }
 0x3d3   :  { %1212 = vmatpush.msra.mxu2 %v1177_v62 }
 0x424   :  { %v864_v31 = vpop.f32.mrf.mxu1 }
 0x425   :  { %v907_v38 = vadd.f32 %v864_v31, %v2481_v34  ;;  %v166_v31 = vadd.f32 %v2484_v28, %v2471_v16 }
 0x427   :  { %v1285_v49 = vmul.f32 -1.442695, %v907_v38 }
 0x429   :  { %1347 = vpow2.f32 %v1285_v49 }
 0x42a   :  { %v884_v29 = vpop.f32.mrf.mxu2 }
 0x42b   :  { %v927_v32 = vadd.f32 %v884_v29, %v163_v48  ;;  %v904_v15 = vpop.f32.mrf.mxu3 }
 0x42c   :  { %v947_v3 = vadd.f32 %v2316_v22, %v904_v15 }
 0x42d   :  { %v1286_v46 = vmul.f32 -1.442695, %v927_v32 }
 0x42f   :  { %v1348_v11 = vpop.eup %1347  ;;  %1349 = vpow2.f32 %v1286_v46 }
 0x430   :  { %v911_v54 = vadd.f32 1.0, %v1348_v11 }
 0x432   :  { %1351 = vrcp.f32 %v911_v54  ;;  %v923_v0 = vand.u32 2147483648, %v911_v54  ;;  %v921_v12 = vand.u32 2147483647, %v911_v54  ;;  %vm917_vm10 = vweird.f32 %v911_v54 }
 0x434   :  { %v924_v50 = vor.u32 1.1754944e-38, %v923_v0  ;;  %vm922_vm12 = vcmp.eq.f32.partialorder %v921_v12, 8.507059e+37  ;;  %v2486_v12 = vld [vmem:[#allocation20_spill] sm:$0xff] }
 0x435   :  { %v1350_v61 = vpop.eup %1349 }
 0x436   :  { %v931_v60 = vadd.f32 1.0, %v1350_v61 }
 0x438   :  { %v1352_v8 = vpop.eup %1351  ;;  %1353 = vrcp.f32 %v931_v60  ;;  %v943_v18 = vand.u32 2147483648, %v931_v60  ;;  %v941_v21 = vand.u32 2147483647, %v931_v60  ;;  %vm937_vm14 = vweird.f32 %v931_v60 }
 0x439   :  { %v913_v35 = vmul.f32 %v1352_v8, %v911_v54  ;;  %vm918_vm9 = vweird.f32 %v1352_v8 }
 0x43a   :  { %vm919_vm11 = vmor %vm917_vm10, %vm918_vm9  ;;  %v944_v63 = vor.u32 1.1754944e-38, %v943_v18  ;;  %vm942_vm0 = vcmp.eq.f32.partialorder %v941_v21, 8.507059e+37 }
 0x43b   :  { %v914_v58 = vsub.f32 1.0, %v913_v35 }
 0x43d   :  { %v915_v1 = vmul.f32 %v1352_v8, %v914_v58 }
 0x43e   :  { %v1354_v39 = vpop.eup %1353 }
 0x43f   :  { %v933_v44 = vmul.f32 %v1354_v39, %v931_v60  ;;  %v916_v57 = vadd.f32 %v1352_v8, %v915_v1  ;;  %vm938_vm13 = vweird.f32 %v1354_v39 }
 0x440   :  { %vm939_vm15 = vmor %vm937_vm14, %vm938_vm13 }
 0x441   :  { %v934_v26 = vsub.f32 1.0, %v933_v44  ;;  %v920_v51 = vsel %vm919_vm11, %v1352_v8, %v916_v57 }
 0x442   :  { %v925_v10 = vsel %vm922_vm12, %v924_v50, %v920_v51 }
 0x443   :  { %v935_v14 = vmul.f32 %v1354_v39, %v934_v26  ;;  %v948_v19 = vmul.f32 %v947_v3, %v925_v10 }
 0x445   :  { %v936_v23 = vadd.f32 %v1354_v39, %v935_v14  ;;  %v949_v27 = vadd.f32 %v948_v19, %v204_v2 }
 0x447   :  { %v940_v30 = vsel %vm939_vm15, %v1354_v39, %v936_v23  ;;  %1355 = vtanh.f32 %v949_v27  ;;  %v207_v39 = vadd.f32 %v2486_v12, %v1914_v47 }
 0x448   :  { %v945_v33 = vsel %vm942_vm0, %v944_v63, %v940_v30 }
 0x449   :  { %v951_v36 = vsub.f32 1.0, %v945_v33  ;;  %v953_v20 = vmul.f32 %v945_v33, %v2241_v37 }
 0x44d   :  { %v1356_v6 = vpop.eup %1355 }
 0x44e   :  { %v952_v17 = vmul.f32 %v1356_v6, %v951_v36  ;;  %v2487_v6 = vld [vmem:[#allocation34_spill] sm:$0xff] }
 0x450   :  { %v2322_v24 = vadd.f32 %v953_v20, %v952_v17  ;;  %v169_v17 = vadd.f32 %v2487_v6, %v2471_v16 }
 0x452   :  { %974 = vmatmul.f32.vlgmr.msrb.gmra.mxu0 %v2322_v24  ;;  %994 = vmatmul.f32.vlgmr.msrb.gmra.mxu1 %v2322_v24 }
 0x453   :  { %1014 = vmatmul.f32.vlgmr.msrb.gmra.mxu2 %v2322_v24 }
 0x45b   :  { %1213 = vmatmul.f32.vlgmr.msra.gmra.mxu2 %v1918_v53 }
 0x463   :  { %1216 = vmatmul.f32.gmra.mxu2 %v1992_v52 }
 0x46b   :  { %1219 = vmatmul.f32.gmra.mxu2 %v2052_v9 }
 0x473   :  { %1222 = vmatmul.f32.gmra.mxu2 %v2184_v5 }
 0x47b   :  { %1225 = vmatmul.f32.gmra.mxu2 %v2241_v37  ;;  %v2339_v37 = vld [vmem:[%s2396_s6] ss:$0 sm:$0xff] }
 0x483   :  { %1228 = vmatmul.f32.gmra.mxu2 %v2322_v24 }
 0x4cf   :  { %v975_v34 = vpop.f32.mrf.mxu0  ;;  %v995_v38 = vpop.f32.mrf.mxu1 }
 0x4d0   :  { %v1018_v49 = vadd.f32 %v975_v34, %v2485_v43  ;;  %v1038_v42 = vadd.f32 %v995_v38, %v166_v31  ;;  %v2488_v34 = vld [vmem:[#allocation26_spill] sm:$0xff] }
 0x4d2   :  { %v1287_v45 = vmul.f32 -1.442695, %v1018_v49  ;;  %v1288_v53 = vmul.f32 -1.442695, %v1038_v42 }
 0x4d4   :  { %1357 = vpow2.f32 %v1287_v45 }
 0x4d5   :  { %1359 = vpow2.f32 %v1288_v53 }
 0x4d6   :  { %v1015_v52 = vpop.f32.mrf.mxu2 }
 0x4d7   :  { %v1058_v58 = vadd.f32 %v2316_v22, %v1015_v52 }
 0x4da   :  { %v1358_v9 = vpop.eup %1357 }
 0x4db   :  { %v1360_v48 = vpop.eup %1359  ;;  %v1022_v5 = vadd.f32 1.0, %v1358_v9 }
 0x4dc   :  { %v1042_v25 = vadd.f32 1.0, %v1360_v48 }
 0x4dd   :  { %1361 = vrcp.f32 %v1022_v5  ;;  %v1034_v55 = vand.u32 2147483648, %v1022_v5  ;;  %v1032_v7 = vand.u32 2147483647, %v1022_v5  ;;  %vm1028_vm2 = vweird.f32 %v1022_v5 }
 0x4de   :  { %1363 = vrcp.f32 %v1042_v25  ;;  %v1214_v29 = vpop.f32.mrf.mxu2  ;;  %v1054_v15 = vand.u32 2147483648, %v1042_v25  ;;  %vm1048_vm6 = vweird.f32 %v1042_v25  ;;  %v1052_v50 = vand.u32 2147483647, %v1042_v25 }
 0x4df   :  { %v1215_v32 = vadd.f32 %v2339_v37, %v1214_v29  ;;  %v1035_v8 = vor.u32 1.1754944e-38, %v1034_v55  ;;  %vm1033_vm4 = vcmp.eq.f32.partialorder %v1032_v7, 8.507059e+37 }
 0x4e0   :  { %v1055_v59 = vor.u32 1.1754944e-38, %v1054_v15  ;;  %vm1053_vm8 = vcmp.eq.f32.partialorder %v1052_v50, 8.507059e+37 }
 0x4e1   :  { %1238 = vst [vmem:[%s2398_s8] sm:$0xff] %v1215_v32 }
 0x4e3   :  { %v1362_v40 = vpop.eup %1361 }
 0x4e4   :  { %v1364_v46 = vpop.eup %1363  ;;  %v1024_v56 = vmul.f32 %v1362_v40, %v1022_v5  ;;  %vm1029_vm1 = vweird.f32 %v1362_v40 }
 0x4e5   :  { %v1044_v41 = vmul.f32 %v1364_v46, %v1042_v25  ;;  %vm1030_vm3 = vmor %vm1028_vm2, %vm1029_vm1  ;;  %vm1049_vm5 = vweird.f32 %v1364_v46 }
 0x4e6   :  { %v1025_v11 = vsub.f32 1.0, %v1024_v56  ;;  %v1217_v4 = vpop.f32.mrf.mxu2  ;;  %vm1050_vm7 = vmor %vm1048_vm6, %vm1049_vm5 }
 0x4e7   :  { %v1045_v54 = vsub.f32 1.0, %v1044_v41  ;;  %v1218_v13 = vadd.f32 %v2339_v37, %v1217_v4 }
 0x4e8   :  { %v1026_v61 = vmul.f32 %v1362_v40, %v1025_v11 }
 0x4e9   :  { %v1046_v60 = vmul.f32 %v1364_v46, %v1045_v54  ;;  %1239 = vst [vmem:[%s2398_s8 + $0x8] sm:$0xff] %v1218_v13 }
 0x4ea   :  { %v1027_v62 = vadd.f32 %v1362_v40, %v1026_v61 }
 0x4eb   :  { %v1047_v0 = vadd.f32 %v1364_v46, %v1046_v60  ;;  %v2489_v60 = vld [vmem:[#allocation22_spill] sm:$0xff] }
 0x4ec   :  { %v1031_v35 = vsel %vm1030_vm3, %v1362_v40, %v1027_v62  ;;  %v210_v62 = vadd.f32 %v2489_v60, %v1914_v47 }
 0x4ed   :  { %v1036_v1 = vsel %vm1033_vm4, %v1035_v8, %v1031_v35  ;;  %v1051_v3 = vsel %vm1050_vm7, %v1364_v46, %v1047_v0 }
 0x4ee   :  { %v1059_v44 = vmul.f32 %v1058_v58, %v1036_v1  ;;  %v1220_v57 = vpop.f32.mrf.mxu2  ;;  %v1056_v2 = vsel %vm1053_vm8, %v1055_v59, %v1051_v3 }
 0x4ef   :  { %v1221_v26 = vadd.f32 %v2339_v37, %v1220_v57  ;;  %v1062_v14 = vsub.f32 1.0, %v1056_v2  ;;  %v1064_v23 = vmul.f32 %v1056_v2, %v2322_v24 }
 0x4f0   :  { %v1060_v51 = vadd.f32 %v1059_v44, %v207_v39 }
 0x4f1   :  { %1240 = vst [vmem:[%s2398_s8 + $0x10] sm:$0xff] %v1221_v26 }
 0x4f2   :  { %1365 = vtanh.f32 %v1060_v51 }
 0x4f6   :  { %v1223_v10 = vpop.f32.mrf.mxu2 }
 0x4f7   :  { %v1224_v18 = vadd.f32 %v2339_v37, %v1223_v10 }
 0x4f8   :  { %v1366_v19 = vpop.eup %1365 }
 0x4f9   :  { %v1063_v21 = vmul.f32 %v1366_v19, %v1062_v14  ;;  %1241 = vst [vmem:[%s2398_s8 + $0x18] sm:$0xff] %v1224_v18 }
 0x4fb   :  { %v2361_v27 = vadd.f32 %v1064_v23, %v1063_v21 }
 0x4fd   :  { %1085 = vmatmul.f32.vlgmr.msrb.gmra.mxu3 %v2361_v27  ;;  %1105 = vmatmul.f32.vlgmr.msra.gmra.mxu0 %v2361_v27 }
 0x4fe   :  { %1125 = vmatmul.f32.vlgmr.msra.gmra.mxu1 %v2361_v27  ;;  %v1226_v63 = vpop.f32.mrf.mxu2  ;;  %1231 = vmatmul.f32.gmra.mxu2 %v2361_v27 }
 0x4ff   :  { %v1227_v30 = vadd.f32 %v2339_v37, %v1226_v63 }
 0x501   :  { %1242 = vst [vmem:[%s2398_s8 + $0x20] sm:$0xff] %v1227_v30 }
 0x506   :  { %v1229_v33 = vpop.f32.mrf.mxu2 }
 0x507   :  { %v1230_v36 = vadd.f32 %v2339_v37, %v1229_v33 }
 0x509   :  { %1243 = vst [vmem:[%s2398_s8 + $0x28] sm:$0xff] %v1230_v36 }
 0x57a   :  { %v1106_v20 = vpop.f32.mrf.mxu0 }
 0x57b   :  { %v1149_v24 = vadd.f32 %v1106_v20, %v169_v17  ;;  %v1126_v41 = vpop.f32.mrf.mxu1 }
 0x57c   :  { %v1169_v55 = vadd.f32 %v2316_v22, %v1126_v41 }
 0x57d   :  { %v1290_v28 = vmul.f32 -1.442695, %v1149_v24 }
 0x57f   :  { %1367 = vpow2.f32 %v1290_v28 }
 0x580   :  { %v1086_v31 = vpop.f32.mrf.mxu3 }
 0x581   :  { %v1129_v38 = vadd.f32 %v1086_v31, %v2488_v34  ;;  %v1232_v43 = vpop.f32.mrf.mxu2 }
 0x582   :  { %v1233_v49 = vadd.f32 %v2339_v37, %v1232_v43 }
 0x583   :  { %v1289_v42 = vmul.f32 -1.442695, %v1129_v38 }
 0x584   :  { %1244 = vst [vmem:[%s2398_s8 + $0x30] sm:$0xff] %v1233_v49 }
 0x585   :  { %v1368_v45 = vpop.eup %1367  ;;  %1369 = vpow2.f32 %v1289_v42 }
 0x586   :  { %v1153_v53 = vadd.f32 1.0, %v1368_v45 }
 0x588   :  { %1371 = vrcp.f32 %v1153_v53  ;;  %v1165_v8 = vand.u32 2147483648, %v1153_v53  ;;  %vm1159_vm14 = vweird.f32 %v1153_v53  ;;  %v1163_v58 = vand.u32 2147483647, %v1153_v53 }
 0x58a   :  { %v1166_v12 = vor.u32 1.1754944e-38, %v1165_v8  ;;  %vm1164_vm0 = vcmp.eq.f32.partialorder %v1163_v58, 8.507059e+37 }
 0x58b   :  { %v1370_v16 = vpop.eup %1369 }
 0x58c   :  { %v1133_v52 = vadd.f32 1.0, %v1370_v16 }
 0x58e   :  { %1373 = vrcp.f32 %v1133_v52  ;;  %v1372_v9 = vpop.eup %1371  ;;  %v1145_v40 = vand.u32 2147483648, %v1133_v52  ;;  %v1143_v56 = vand.u32 2147483647, %v1133_v52  ;;  %vm1139_vm10 = vweird.f32 %v1133_v52 }
 0x58f   :  { %v1155_v48 = vmul.f32 %v1372_v9, %v1153_v53  ;;  %vm1160_vm13 = vweird.f32 %v1372_v9 }
 0x590   :  { %v1146_v54 = vor.u32 1.1754944e-38, %v1145_v40  ;;  %vm1144_vm12 = vcmp.eq.f32.partialorder %v1143_v56, 8.507059e+37  ;;  %vm1161_vm15 = vmor %vm1159_vm14, %vm1160_vm13 }
 0x591   :  { %v1156_v29 = vsub.f32 1.0, %v1155_v48 }
 0x593   :  { %v1157_v11 = vmul.f32 %v1372_v9, %v1156_v29 }
 0x594   :  { %v1374_v5 = vpop.eup %1373 }
 0x595   :  { %v1135_v25 = vmul.f32 %v1374_v5, %v1133_v52  ;;  %vm1140_vm9 = vweird.f32 %v1374_v5  ;;  %v1158_v7 = vadd.f32 %v1372_v9, %v1157_v11 }
 0x596   :  { %vm1141_vm11 = vmor %vm1139_vm10, %vm1140_vm9 }
 0x597   :  { %v1136_v32 = vsub.f32 1.0, %v1135_v25  ;;  %v1162_v1 = vsel %vm1161_vm15, %v1372_v9, %v1158_v7 }
 0x598   :  { %v1167_v39 = vsel %vm1164_vm0, %v1166_v12, %v1162_v1 }
 0x599   :  { %v1137_v46 = vmul.f32 %v1374_v5, %v1136_v32  ;;  %v1173_v22 = vsub.f32 1.0, %v1167_v39  ;;  %v1175_v57 = vmul.f32 %v1167_v39, %v2361_v27 }
 0x59b   :  { %v1138_v4 = vadd.f32 %v1374_v5, %v1137_v46 }
 0x59d   :  { %v1142_v13 = vsel %vm1141_vm11, %v1374_v5, %v1138_v4 }
 0x59e   :  { %v1147_v61 = vsel %vm1144_vm12, %v1146_v54, %v1142_v13 }
 0x59f   :  { %v1170_v35 = vmul.f32 %v1169_v55, %v1147_v61 }
 0x5a1   :  { %v1171_v0 = vadd.f32 %v1170_v35, %v210_v62 }
 0x5a3   :  { %1375 = vtanh.f32 %v1171_v0 }
 0x5a9   :  { %v1376_v15 = vpop.eup %1375 }
 0x5aa   :  { %v1174_v44 = vmul.f32 %v1376_v15, %v1173_v22 }
 0x5ac   :  { %v1176_v50 = vadd.f32 %v1175_v57, %v1174_v44 }
 0x5ae   :  { %1234 = vmatmul.f32.gmra.mxu2 %v1176_v50 }
 0x631   :  { %v1235_v26 = vpop.f32.mrf.mxu2 }
 0x632   :  { %v1236_v47 = vadd.f32 %v2339_v37, %v1235_v26 }
 0x634   :  { %1245 = vst [vmem:[%s2398_s8 + $0x38] sm:$0xff] %v1236_v47 }
 0x635   :  { %1250 = vsyncpa [#allocation4], 1 }

</bundles_post_ra>
